<compile_context>
chip_gen: v7x
topology: tpu7x:2x2x1
jax: 0.10.0
libtpu: 0.0.40
codegen_flags: <defaults>
</compile_context>

<pallas_src>
import functools

import jax
import jax.numpy as jnp
from jax.experimental import pallas as pl
from jax.experimental.pallas import tpu as pltpu


# Off-center depthwise taps (dy, dx); order must match host-side packing.
_OFF_TAPS = ((-1, -1), (-1, 0), (-1, 1), (0, -1), (0, 1), (1, -1), (1, 0), (1, 1))


# --------------------------------------------------------------------------
# Pallas kernel: one grid step == `bt` batch images, full spatial extent.
# --------------------------------------------------------------------------
def _repghost_bottleneck_kernel(x_ref, w1_ref, c1_ref, wm1_ref,
                                w2_ref, c2_ref, wm2_ref, o_ref, *, W, bt):
    batched = bt > 1

    def ghost(x_in, w, c, wm_ref, relu):
        # primary_conv: 1x1 conv (BN scale pre-folded into w) + bias (+ ReLU)
        if batched:
            # One batched MXU matmul over the whole block (no Python unroll).
            wb = jnp.broadcast_to(w, (bt,) + w.shape)            # (bt, Co, Ci)
            y = jax.lax.dot_general(
                wb, x_in,
                dimension_numbers=(((2,), (1,)), ((0,), (0,))),
                preferred_element_type=jnp.float32)              # (bt, Co, HW)
        else:
            y = jnp.dot(w, x_in, preferred_element_type=jnp.float32)  # (Co, HW)
        y = y + c[:, 0:1]                                        # primary bias
        if relu:
            y = jnp.maximum(y, 0.0)

        # cheap_operation (3x3 depthwise + BN) fused with the fusion_bn branch:
        #   acc = x1*(s_fu + w_dw_center*s_dw) + (b_fu + b_dw)
        #         + sum_t (w_dw[t]*s_dw*edge_mask[t]) * shifted_t(x1)
        # The masked tap weights wm[t] are precomputed host-side, so this loop
        # is mul+add only (no select, no mask construction).
        acc = y * c[:, 1:2] + c[:, 2:3]
        for t, (dy, dx) in enumerate(_OFF_TAPS):
            # In-register lane shift of the flattened (row-major) spatial axis:
            # shifted[..., s] = x1[..., s + dy*W + dx]; wrapped / out-of-image
            # positions are killed by the zeros folded into wm[t].
            shifted = jnp.roll(y, -(dy * W + dx), axis=-1)
            acc = acc + shifted * wm_ref[t]
        if relu:
            acc = jnp.maximum(acc, 0.0)
        return acc

    # Small parameter loads, once per grid step.
    w1 = w1_ref[...]                    # (Cmid, Cin)
    c1 = c1_ref[...]                    # (Cmid, 3)
    w2 = w2_ref[...]                    # (Cout, Cmid)
    c2 = c2_ref[...]                    # (Cout, 3)

    x = x_ref[...] if batched else x_ref[0]          # (bt, Cin, HW) / (Cin, HW)
    g1 = ghost(x, w1, c1, wm1_ref, relu=True)
    g2 = ghost(g1, w2, c2, wm2_ref, relu=False)
    # identity shortcut (in_channels == out_channels, stride == (1, 1))
    res = (g2 + x).astype(o_ref.dtype)
    if batched:
        o_ref[...] = res
    else:
        o_ref[0] = res


# --------------------------------------------------------------------------
# Host-side folding / packing of the per-module parameters
# --------------------------------------------------------------------------
def _edge_masks(h, w):
    """(8, H*W) f32 edge masks for the off-center taps (host-side, no kernel div/mod)."""
    hw = h * w
    lane = jnp.arange(hw, dtype=jnp.int32)
    row = lane // w
    col = lane % w
    planes = []
    for dy, dx in _OFF_TAPS:
        m = jnp.ones((hw,), dtype=jnp.bool_)
        if dy == 1:
            m = jnp.logical_and(m, row < h - 1)
        elif dy == -1:
            m = jnp.logical_and(m, row >= 1)
        if dx == 1:
            m = jnp.logical_and(m, col < w - 1)
        elif dx == -1:
            m = jnp.logical_and(m, col >= 1)
        planes.append(m)
    return jnp.stack(planes).astype(jnp.float32)


def _pack_module(w_pc, s_pc, b_pc, w_dw, s_dw, b_dw, s_fu, b_fu, mask8):
    """Returns:
         w_folded : (Cout, Cin)    1x1 weight with primary-BN scale folded in
         cvec     : (Cout, 3)      [primary bias, fusion+center scale, merged bias]
         wm       : (8, Cout, HW)  off-center tap weights * edge masks
    """
    cin, cout = w_pc.shape
    w_folded = (w_pc * s_pc.reshape(1, cout)).T.astype(jnp.float32)
    wdw9 = w_dw.reshape(9, cout) * s_dw.reshape(1, cout)            # (9, Cout)
    center = wdw9[4]                                                # (Cout,)
    off = jnp.concatenate([wdw9[:4], wdw9[5:]], axis=0)             # (8, Cout), matches _OFF_TAPS
    cvec = jnp.stack([b_pc.reshape(cout),
                      s_fu.reshape(cout) + center,
                      b_fu.reshape(cout) + b_dw.reshape(cout)], axis=1)
    wm = off[:, :, None] * mask8[:, None, :]                        # (8, Cout, HW)
    return w_folded, cvec.astype(jnp.float32), wm.astype(jnp.float32)


def _pick_bt(n, cin, cout, hw, vmem_budget_bytes=24 << 20):
    """Batch tile: >= 2 grid steps when n > 1 (v7x megacore), VMEM-aware."""
    if n <= 1:
        return 1
    per_img = 2 * (cin + cout) * hw * 4       # double-buffered in + out, f32
    cap = min(8, n // 2, max(1, vmem_budget_bytes // max(per_img, 1)))
    cap = max(1, cap)
    return max(d for d in range(1, cap + 1) if n % d == 0)


# --------------------------------------------------------------------------
# Wrapper (accepts / returns NCHW, feeds the kernel channel-major tiles)
# --------------------------------------------------------------------------
def repghost_bottleneck(x_nchw, params):
    n, cin, h, w = x_nchw.shape
    hw = h * w
    cmid = params["w1_pc"].shape[1]
    cout = params["w2_pc"].shape[1]
    assert cin == cout, "identity shortcut requires in_channels == out_channels"

    mask8 = _edge_masks(h, w)
    w1, c1, wm1 = _pack_module(params["w1_pc"], params["s1_pc"], params["b1_pc"],
                               params["w1_dw"], params["s1_dw"], params["b1_dw"],
                               params["s1_fu"], params["b1_fu"], mask8)
    w2, c2, wm2 = _pack_module(params["w2_pc"], params["s2_pc"], params["b2_pc"],
                               params["w2_dw"], params["s2_dw"], params["b2_dw"],
                               params["s2_fu"], params["b2_fu"], mask8)

    # NCHW -> (N, C, H*W): free reshape, no transpose / extra HBM traffic.
    x = x_nchw.reshape(n, cin, hw).astype(jnp.float32)

    bt = _pick_bt(n, cin, cout, hw)
    grid = (n // bt,)

    kernel = functools.partial(_repghost_bottleneck_kernel, W=w, bt=bt)

    out = pl.pallas_call(
        kernel,
        out_shape=jax.ShapeDtypeStruct((n, cout, hw), jnp.float32),
        grid_spec=pltpu.PrefetchScalarGridSpec(
            num_scalar_prefetch=0,
            grid=grid,
            in_specs=[
                pl.BlockSpec((bt, cin, hw), lambda i: (i, 0, 0)),
                # Constant-index parameter blocks: DMA'd once, stay resident.
                pl.BlockSpec((cmid, cin), lambda i: (0, 0)),
                pl.BlockSpec((cmid, 3), lambda i: (0, 0)),
                pl.BlockSpec((8, cmid, hw), lambda i: (0, 0, 0)),
                pl.BlockSpec((cout, cmid), lambda i: (0, 0)),
                pl.BlockSpec((cout, 3), lambda i: (0, 0)),
                pl.BlockSpec((8, cout, hw), lambda i: (0, 0, 0)),
            ],
            out_specs=pl.BlockSpec((bt, cout, hw), lambda i: (i, 0, 0)),
        ),
        compiler_params=pltpu.CompilerParams(
            dimension_semantics=("parallel",)),
    )(x, w1, c1, wm1, w2, c2, wm2)

    return out.reshape(n, cout, h, w)                              # back to NCHW


# --------------------------------------------------------------------------
# Deterministic parameter construction (BN folded to scale/bias, eps=1e-5)
# --------------------------------------------------------------------------
def _folded_bn(key, c):
    k1, k2, k3, k4 = jax.random.split(key, 4)
    gamma = jax.random.uniform(k1, (c,), minval=0.5, maxval=1.5)
    beta = 0.1 * jax.random.normal(k2, (c,))
    mean = 0.1 * jax.random.normal(k3, (c,))
    var = jax.random.uniform(k4, (c,), minval=0.5, maxval=1.5)
    scale = gamma / jnp.sqrt(var + 1e-5)
    bias = beta - mean * scale
    return (scale.reshape(1, c).astype(jnp.float32),
            bias.reshape(1, c).astype(jnp.float32))


def make_params(key, cin, cmid, cout):
    ks = jax.random.split(key, 10)
    p = {}
    # ghost1
    p["w1_pc"] = (0.2 * jax.random.normal(ks[0], (cin, cmid))).astype(jnp.float32)
    p["s1_pc"], p["b1_pc"] = _folded_bn(ks[1], cmid)
    p["w1_dw"] = (0.2 * jax.random.normal(ks[2], (3, 3, cmid))).astype(jnp.float32)
    p["s1_dw"], p["b1_dw"] = _folded_bn(ks[3], cmid)
    p["s1_fu"], p["b1_fu"] = _folded_bn(ks[4], cmid)
    # ghost2
    p["w2_pc"] = (0.2 * jax.random.normal(ks[5], (cmid, cout))).astype(jnp.float32)
    p["s2_pc"], p["b2_pc"] = _folded_bn(ks[6], cout)
    p["w2_dw"] = (0.2 * jax.random.normal(ks[7], (3, 3, cout))).astype(jnp.float32)
    p["s2_dw"], p["b2_dw"] = _folded_bn(ks[8], cout)
    p["s2_fu"], p["b2_fu"] = _folded_bn(ks[9], cout)
    return p


# --------------------------------------------------------------------------
# Pure-JAX reference (for a correctness cross-check)
# --------------------------------------------------------------------------
def ref_forward(x_nchw, p):
    x = jnp.transpose(x_nchw, (0, 2, 3, 1)).astype(jnp.float32)

    def ghost(inp, wpc, spc, bpc, wdw, sdw, bdw, sfu, bfu, relu):
        c = wpc.shape[1]
        y = jnp.einsum("nhwc,cd->nhwd", inp, wpc) * spc + bpc
        if relu:
            y = jax.nn.relu(y)
        dw = jax.lax.conv_general_dilated(
            y, wdw.reshape(3, 3, 1, c), window_strides=(1, 1), padding="SAME",
            dimension_numbers=("NHWC", "HWIO", "NHWC"), feature_group_count=c)
        out = dw * sdw + bdw + (y * sfu + bfu)
        if relu:
            out = jax.nn.relu(out)
        return out

    g1 = ghost(x, p["w1_pc"], p["s1_pc"], p["b1_pc"], p["w1_dw"], p["s1_dw"],
               p["b1_dw"], p["s1_fu"], p["b1_fu"], relu=True)
    g2 = ghost(g1, p["w2_pc"], p["s2_pc"], p["b2_pc"], p["w2_dw"], p["s2_dw"],
               p["b2_dw"], p["s2_fu"], p["b2_fu"], relu=False)
    out = g2 + x
    return jnp.transpose(out, (0, 3, 1, 2))


# --------------------------------------------------------------------------
if __name__ == "__main__":
    key = jax.random.PRNGKey(0)
    k_x, k_p = jax.random.split(key)

    N, C_IN, C_MID, C_OUT, H, W = 2, 16, 32, 16, 16, 16
    x = jax.random.normal(k_x, (N, C_IN, H, W), dtype=jnp.float32)
    params = make_params(k_p, C_IN, C_MID, C_OUT)

    fwd = jax.jit(repghost_bottleneck)
    out = jax.block_until_ready(fwd(x, params))
    ref = jax.block_until_ready(ref_forward(x, params))

    assert out.shape == (N, C_OUT, H, W)
    assert jnp.allclose(out, ref, rtol=1e-4, atol=5e-4), (
        float(jnp.max(jnp.abs(out - ref))))

    print("KERNEL_OK")
</pallas_src>

<mosaic_0001>
module attributes {stable_mosaic.version = 11 : i64} {
  func.func @_repghost_bottleneck_kernel(%arg0: i32, %arg1: memref<1x16x256xf32, #tpu.memory_space<vmem>>, %arg2: memref<32x16xf32, #tpu.memory_space<vmem>>, %arg3: memref<32x3xf32, #tpu.memory_space<vmem>>, %arg4: memref<8x32x256xf32, #tpu.memory_space<vmem>>, %arg5: memref<16x32xf32, #tpu.memory_space<vmem>>, %arg6: memref<16x3xf32, #tpu.memory_space<vmem>>, %arg7: memref<8x16x256xf32, #tpu.memory_space<vmem>>, %arg8: memref<1x16x256xf32, #tpu.memory_space<vmem>>) attributes {dimension_semantics = [#tpu.dimension_semantics<parallel>], iteration_bounds = array<i64: 2>, scalar_prefetch = 0 : i64, scratch_operands = 0 : i64, tpu.core_type = #tpu.core_type<tc>, window_params = [{transform_indices = @transform_0, window_bounds = array<i64: 1, 16, 256>}, {pipeline_mode = #tpu.pipeline_mode<synchronous>, transform_indices = @transform_1, window_bounds = array<i64: 32, 16>}, {pipeline_mode = #tpu.pipeline_mode<synchronous>, transform_indices = @transform_2, window_bounds = array<i64: 32, 3>}, {pipeline_mode = #tpu.pipeline_mode<synchronous>, transform_indices = @transform_3, window_bounds = array<i64: 8, 32, 256>}, {pipeline_mode = #tpu.pipeline_mode<synchronous>, transform_indices = @transform_4, window_bounds = array<i64: 16, 32>}, {pipeline_mode = #tpu.pipeline_mode<synchronous>, transform_indices = @transform_5, window_bounds = array<i64: 16, 3>}, {pipeline_mode = #tpu.pipeline_mode<synchronous>, transform_indices = @transform_6, window_bounds = array<i64: 8, 16, 256>}, {transform_indices = @transform_7, window_bounds = array<i64: 1, 16, 256>}]} {
    %c0 = arith.constant 0 : index
    %c0_0 = arith.constant 0 : index
    %0 = vector.load %arg2[%c0, %c0_0] : memref<32x16xf32, #tpu.memory_space<vmem>>, vector<32x16xf32>
    %c0_1 = arith.constant 0 : index
    %c0_2 = arith.constant 0 : index
    %1 = vector.load %arg3[%c0_1, %c0_2] : memref<32x3xf32, #tpu.memory_space<vmem>>, vector<32x3xf32>
    %c0_3 = arith.constant 0 : index
    %c0_4 = arith.constant 0 : index
    %2 = vector.load %arg5[%c0_3, %c0_4] : memref<16x32xf32, #tpu.memory_space<vmem>>, vector<16x32xf32>
    %c0_5 = arith.constant 0 : index
    %c0_6 = arith.constant 0 : index
    %3 = vector.load %arg6[%c0_5, %c0_6] : memref<16x3xf32, #tpu.memory_space<vmem>>, vector<16x3xf32>
    %c0_7 = arith.constant 0 : index
    %c0_8 = arith.constant 0 : index
    %c0_9 = arith.constant 0 : index
    %4 = vector.load %arg1[%c0_7, %c0_8, %c0_9] : memref<1x16x256xf32, #tpu.memory_space<vmem>>, vector<1x16x256xf32>
    %5 = vector.shape_cast %4 : vector<1x16x256xf32> to vector<16x256xf32>
    %cst = arith.constant dense<0.000000e+00> : vector<32x256xf32>
    %6 = tpu.matmul %0, %5, %cst {dimension_numbers = #tpu.dot_dimension_numbers<[1], [0], [0], [1], [0, 0, 1, 1], [], []>} : vector<32x16xf32>, vector<16x256xf32>, vector<32x256xf32> -> vector<32x256xf32>
    %7 = vector.extract_strided_slice %1 {offsets = [0, 0], sizes = [32, 1], strides = [1, 1]} : vector<32x3xf32> to vector<32x1xf32>
    %8 = vector.broadcast %7 : vector<32x1xf32> to vector<32x256xf32>
    %9 = arith.addf %6, %8 : vector<32x256xf32>
    %cst_10 = arith.constant 0.000000e+00 : f32
    %10 = vector.broadcast %cst_10 : f32 to vector<32x256xf32>
    %11 = arith.maximumf %9, %10 : vector<32x256xf32>
    %12 = vector.extract_strided_slice %1 {offsets = [0, 1], sizes = [32, 1], strides = [1, 1]} : vector<32x3xf32> to vector<32x1xf32>
    %13 = vector.broadcast %12 : vector<32x1xf32> to vector<32x256xf32>
    %14 = arith.mulf %11, %13 : vector<32x256xf32>
    %15 = vector.extract_strided_slice %1 {offsets = [0, 2], sizes = [32, 1], strides = [1, 1]} : vector<32x3xf32> to vector<32x1xf32>
    %16 = vector.broadcast %15 : vector<32x1xf32> to vector<32x256xf32>
    %17 = arith.addf %14, %16 : vector<32x256xf32>
    %18 = vector.extract_strided_slice %11 {offsets = [0, 239], sizes = [32, 17], strides = [1, 1]} : vector<32x256xf32> to vector<32x17xf32>
    %19 = vector.extract_strided_slice %11 {offsets = [0, 0], sizes = [32, 239], strides = [1, 1]} : vector<32x256xf32> to vector<32x239xf32>
    %20 = tpu.concatenate %18, %19 in 1 : vector<32x17xf32>, vector<32x239xf32> -> vector<32x256xf32>
    %c0_11 = arith.constant 0 : index
    %c0_12 = arith.constant 0 : index
    %c0_13 = arith.constant 0 : index
    %21 = vector.load %arg4[%c0_11, %c0_12, %c0_13] : memref<8x32x256xf32, #tpu.memory_space<vmem>>, vector<1x32x256xf32>
    %22 = vector.shape_cast %21 : vector<1x32x256xf32> to vector<32x256xf32>
    %23 = arith.mulf %20, %22 : vector<32x256xf32>
    %24 = arith.addf %17, %23 : vector<32x256xf32>
    %25 = vector.extract_strided_slice %11 {offsets = [0, 240], sizes = [32, 16], strides = [1, 1]} : vector<32x256xf32> to vector<32x16xf32>
    %26 = vector.extract_strided_slice %11 {offsets = [0, 0], sizes = [32, 240], strides = [1, 1]} : vector<32x256xf32> to vector<32x240xf32>
    %27 = tpu.concatenate %25, %26 in 1 : vector<32x16xf32>, vector<32x240xf32> -> vector<32x256xf32>
    %c1 = arith.constant 1 : index
    %c0_14 = arith.constant 0 : index
    %c0_15 = arith.constant 0 : index
    %28 = vector.load %arg4[%c1, %c0_14, %c0_15] : memref<8x32x256xf32, #tpu.memory_space<vmem>>, vector<1x32x256xf32>
    %29 = vector.shape_cast %28 : vector<1x32x256xf32> to vector<32x256xf32>
    %30 = arith.mulf %27, %29 : vector<32x256xf32>
    %31 = arith.addf %24, %30 : vector<32x256xf32>
    %32 = vector.extract_strided_slice %11 {offsets = [0, 241], sizes = [32, 15], strides = [1, 1]} : vector<32x256xf32> to vector<32x15xf32>
    %33 = vector.extract_strided_slice %11 {offsets = [0, 0], sizes = [32, 241], strides = [1, 1]} : vector<32x256xf32> to vector<32x241xf32>
    %34 = tpu.concatenate %32, %33 in 1 : vector<32x15xf32>, vector<32x241xf32> -> vector<32x256xf32>
    %c2 = arith.constant 2 : index
    %c0_16 = arith.constant 0 : index
    %c0_17 = arith.constant 0 : index
    %35 = vector.load %arg4[%c2, %c0_16, %c0_17] : memref<8x32x256xf32, #tpu.memory_space<vmem>>, vector<1x32x256xf32>
    %36 = vector.shape_cast %35 : vector<1x32x256xf32> to vector<32x256xf32>
    %37 = arith.mulf %34, %36 : vector<32x256xf32>
    %38 = arith.addf %31, %37 : vector<32x256xf32>
    %39 = vector.extract_strided_slice %11 {offsets = [0, 255], sizes = [32, 1], strides = [1, 1]} : vector<32x256xf32> to vector<32x1xf32>
    %40 = vector.extract_strided_slice %11 {offsets = [0, 0], sizes = [32, 255], strides = [1, 1]} : vector<32x256xf32> to vector<32x255xf32>
    %41 = tpu.concatenate %39, %40 in 1 : vector<32x1xf32>, vector<32x255xf32> -> vector<32x256xf32>
    %c3 = arith.constant 3 : index
    %c0_18 = arith.constant 0 : index
    %c0_19 = arith.constant 0 : index
    %42 = vector.load %arg4[%c3, %c0_18, %c0_19] : memref<8x32x256xf32, #tpu.memory_space<vmem>>, vector<1x32x256xf32>
    %43 = vector.shape_cast %42 : vector<1x32x256xf32> to vector<32x256xf32>
    %44 = arith.mulf %41, %43 : vector<32x256xf32>
    %45 = arith.addf %38, %44 : vector<32x256xf32>
    %46 = vector.extract_strided_slice %11 {offsets = [0, 1], sizes = [32, 255], strides = [1, 1]} : vector<32x256xf32> to vector<32x255xf32>
    %47 = vector.extract_strided_slice %11 {offsets = [0, 0], sizes = [32, 1], strides = [1, 1]} : vector<32x256xf32> to vector<32x1xf32>
    %48 = tpu.concatenate %46, %47 in 1 : vector<32x255xf32>, vector<32x1xf32> -> vector<32x256xf32>
    %c4 = arith.constant 4 : index
    %c0_20 = arith.constant 0 : index
    %c0_21 = arith.constant 0 : index
    %49 = vector.load %arg4[%c4, %c0_20, %c0_21] : memref<8x32x256xf32, #tpu.memory_space<vmem>>, vector<1x32x256xf32>
    %50 = vector.shape_cast %49 : vector<1x32x256xf32> to vector<32x256xf32>
    %51 = arith.mulf %48, %50 : vector<32x256xf32>
    %52 = arith.addf %45, %51 : vector<32x256xf32>
    %53 = vector.extract_strided_slice %11 {offsets = [0, 15], sizes = [32, 241], strides = [1, 1]} : vector<32x256xf32> to vector<32x241xf32>
    %54 = vector.extract_strided_slice %11 {offsets = [0, 0], sizes = [32, 15], strides = [1, 1]} : vector<32x256xf32> to vector<32x15xf32>
    %55 = tpu.concatenate %53, %54 in 1 : vector<32x241xf32>, vector<32x15xf32> -> vector<32x256xf32>
    %c5 = arith.constant 5 : index
    %c0_22 = arith.constant 0 : index
    %c0_23 = arith.constant 0 : index
    %56 = vector.load %arg4[%c5, %c0_22, %c0_23] : memref<8x32x256xf32, #tpu.memory_space<vmem>>, vector<1x32x256xf32>
    %57 = vector.shape_cast %56 : vector<1x32x256xf32> to vector<32x256xf32>
    %58 = arith.mulf %55, %57 : vector<32x256xf32>
    %59 = arith.addf %52, %58 : vector<32x256xf32>
    %60 = vector.extract_strided_slice %11 {offsets = [0, 16], sizes = [32, 240], strides = [1, 1]} : vector<32x256xf32> to vector<32x240xf32>
    %61 = vector.extract_strided_slice %11 {offsets = [0, 0], sizes = [32, 16], strides = [1, 1]} : vector<32x256xf32> to vector<32x16xf32>
    %62 = tpu.concatenate %60, %61 in 1 : vector<32x240xf32>, vector<32x16xf32> -> vector<32x256xf32>
    %c6 = arith.constant 6 : index
    %c0_24 = arith.constant 0 : index
    %c0_25 = arith.constant 0 : index
    %63 = vector.load %arg4[%c6, %c0_24, %c0_25] : memref<8x32x256xf32, #tpu.memory_space<vmem>>, vector<1x32x256xf32>
    %64 = vector.shape_cast %63 : vector<1x32x256xf32> to vector<32x256xf32>
    %65 = arith.mulf %62, %64 : vector<32x256xf32>
    %66 = arith.addf %59, %65 : vector<32x256xf32>
    %67 = vector.extract_strided_slice %11 {offsets = [0, 17], sizes = [32, 239], strides = [1, 1]} : vector<32x256xf32> to vector<32x239xf32>
    %68 = vector.extract_strided_slice %11 {offsets = [0, 0], sizes = [32, 17], strides = [1, 1]} : vector<32x256xf32> to vector<32x17xf32>
    %69 = tpu.concatenate %67, %68 in 1 : vector<32x239xf32>, vector<32x17xf32> -> vector<32x256xf32>
    %c7 = arith.constant 7 : index
    %c0_26 = arith.constant 0 : index
    %c0_27 = arith.constant 0 : index
    %70 = vector.load %arg4[%c7, %c0_26, %c0_27] : memref<8x32x256xf32, #tpu.memory_space<vmem>>, vector<1x32x256xf32>
    %71 = vector.shape_cast %70 : vector<1x32x256xf32> to vector<32x256xf32>
    %72 = arith.mulf %69, %71 : vector<32x256xf32>
    %73 = arith.addf %66, %72 : vector<32x256xf32>
    %cst_28 = arith.constant 0.000000e+00 : f32
    %74 = vector.broadcast %cst_28 : f32 to vector<32x256xf32>
    %75 = arith.maximumf %73, %74 : vector<32x256xf32>
    %cst_29 = arith.constant dense<0.000000e+00> : vector<16x256xf32>
    %76 = tpu.matmul %2, %75, %cst_29 {dimension_numbers = #tpu.dot_dimension_numbers<[1], [0], [0], [1], [0, 0, 1, 1], [], []>} : vector<16x32xf32>, vector<32x256xf32>, vector<16x256xf32> -> vector<16x256xf32>
    %77 = vector.extract_strided_slice %3 {offsets = [0, 0], sizes = [16, 1], strides = [1, 1]} : vector<16x3xf32> to vector<16x1xf32>
    %78 = vector.broadcast %77 : vector<16x1xf32> to vector<16x256xf32>
    %79 = arith.addf %76, %78 : vector<16x256xf32>
    %80 = vector.extract_strided_slice %3 {offsets = [0, 1], sizes = [16, 1], strides = [1, 1]} : vector<16x3xf32> to vector<16x1xf32>
    %81 = vector.broadcast %80 : vector<16x1xf32> to vector<16x256xf32>
    %82 = arith.mulf %79, %81 : vector<16x256xf32>
    %83 = vector.extract_strided_slice %3 {offsets = [0, 2], sizes = [16, 1], strides = [1, 1]} : vector<16x3xf32> to vector<16x1xf32>
    %84 = vector.broadcast %83 : vector<16x1xf32> to vector<16x256xf32>
    %85 = arith.addf %82, %84 : vector<16x256xf32>
    %86 = vector.extract_strided_slice %79 {offsets = [0, 239], sizes = [16, 17], strides = [1, 1]} : vector<16x256xf32> to vector<16x17xf32>
    %87 = vector.extract_strided_slice %79 {offsets = [0, 0], sizes = [16, 239], strides = [1, 1]} : vector<16x256xf32> to vector<16x239xf32>
    %88 = tpu.concatenate %86, %87 in 1 : vector<16x17xf32>, vector<16x239xf32> -> vector<16x256xf32>
    %c0_30 = arith.constant 0 : index
    %c0_31 = arith.constant 0 : index
    %c0_32 = arith.constant 0 : index
    %89 = vector.load %arg7[%c0_30, %c0_31, %c0_32] : memref<8x16x256xf32, #tpu.memory_space<vmem>>, vector<1x16x256xf32>
    %90 = vector.shape_cast %89 : vector<1x16x256xf32> to vector<16x256xf32>
    %91 = arith.mulf %88, %90 : vector<16x256xf32>
    %92 = arith.addf %85, %91 : vector<16x256xf32>
    %93 = vector.extract_strided_slice %79 {offsets = [0, 240], sizes = [16, 16], strides = [1, 1]} : vector<16x256xf32> to vector<16x16xf32>
    %94 = vector.extract_strided_slice %79 {offsets = [0, 0], sizes = [16, 240], strides = [1, 1]} : vector<16x256xf32> to vector<16x240xf32>
    %95 = tpu.concatenate %93, %94 in 1 : vector<16x16xf32>, vector<16x240xf32> -> vector<16x256xf32>
    %c1_33 = arith.constant 1 : index
    %c0_34 = arith.constant 0 : index
    %c0_35 = arith.constant 0 : index
    %96 = vector.load %arg7[%c1_33, %c0_34, %c0_35] : memref<8x16x256xf32, #tpu.memory_space<vmem>>, vector<1x16x256xf32>
    %97 = vector.shape_cast %96 : vector<1x16x256xf32> to vector<16x256xf32>
    %98 = arith.mulf %95, %97 : vector<16x256xf32>
    %99 = arith.addf %92, %98 : vector<16x256xf32>
    %100 = vector.extract_strided_slice %79 {offsets = [0, 241], sizes = [16, 15], strides = [1, 1]} : vector<16x256xf32> to vector<16x15xf32>
    %101 = vector.extract_strided_slice %79 {offsets = [0, 0], sizes = [16, 241], strides = [1, 1]} : vector<16x256xf32> to vector<16x241xf32>
    %102 = tpu.concatenate %100, %101 in 1 : vector<16x15xf32>, vector<16x241xf32> -> vector<16x256xf32>
    %c2_36 = arith.constant 2 : index
    %c0_37 = arith.constant 0 : index
    %c0_38 = arith.constant 0 : index
    %103 = vector.load %arg7[%c2_36, %c0_37, %c0_38] : memref<8x16x256xf32, #tpu.memory_space<vmem>>, vector<1x16x256xf32>
    %104 = vector.shape_cast %103 : vector<1x16x256xf32> to vector<16x256xf32>
    %105 = arith.mulf %102, %104 : vector<16x256xf32>
    %106 = arith.addf %99, %105 : vector<16x256xf32>
    %107 = vector.extract_strided_slice %79 {offsets = [0, 255], sizes = [16, 1], strides = [1, 1]} : vector<16x256xf32> to vector<16x1xf32>
    %108 = vector.extract_strided_slice %79 {offsets = [0, 0], sizes = [16, 255], strides = [1, 1]} : vector<16x256xf32> to vector<16x255xf32>
    %109 = tpu.concatenate %107, %108 in 1 : vector<16x1xf32>, vector<16x255xf32> -> vector<16x256xf32>
    %c3_39 = arith.constant 3 : index
    %c0_40 = arith.constant 0 : index
    %c0_41 = arith.constant 0 : index
    %110 = vector.load %arg7[%c3_39, %c0_40, %c0_41] : memref<8x16x256xf32, #tpu.memory_space<vmem>>, vector<1x16x256xf32>
    %111 = vector.shape_cast %110 : vector<1x16x256xf32> to vector<16x256xf32>
    %112 = arith.mulf %109, %111 : vector<16x256xf32>
    %113 = arith.addf %106, %112 : vector<16x256xf32>
    %114 = vector.extract_strided_slice %79 {offsets = [0, 1], sizes = [16, 255], strides = [1, 1]} : vector<16x256xf32> to vector<16x255xf32>
    %115 = vector.extract_strided_slice %79 {offsets = [0, 0], sizes = [16, 1], strides = [1, 1]} : vector<16x256xf32> to vector<16x1xf32>
    %116 = tpu.concatenate %114, %115 in 1 : vector<16x255xf32>, vector<16x1xf32> -> vector<16x256xf32>
    %c4_42 = arith.constant 4 : index
    %c0_43 = arith.constant 0 : index
    %c0_44 = arith.constant 0 : index
    %117 = vector.load %arg7[%c4_42, %c0_43, %c0_44] : memref<8x16x256xf32, #tpu.memory_space<vmem>>, vector<1x16x256xf32>
    %118 = vector.shape_cast %117 : vector<1x16x256xf32> to vector<16x256xf32>
    %119 = arith.mulf %116, %118 : vector<16x256xf32>
    %120 = arith.addf %113, %119 : vector<16x256xf32>
    %121 = vector.extract_strided_slice %79 {offsets = [0, 15], sizes = [16, 241], strides = [1, 1]} : vector<16x256xf32> to vector<16x241xf32>
    %122 = vector.extract_strided_slice %79 {offsets = [0, 0], sizes = [16, 15], strides = [1, 1]} : vector<16x256xf32> to vector<16x15xf32>
    %123 = tpu.concatenate %121, %122 in 1 : vector<16x241xf32>, vector<16x15xf32> -> vector<16x256xf32>
    %c5_45 = arith.constant 5 : index
    %c0_46 = arith.constant 0 : index
    %c0_47 = arith.constant 0 : index
    %124 = vector.load %arg7[%c5_45, %c0_46, %c0_47] : memref<8x16x256xf32, #tpu.memory_space<vmem>>, vector<1x16x256xf32>
    %125 = vector.shape_cast %124 : vector<1x16x256xf32> to vector<16x256xf32>
    %126 = arith.mulf %123, %125 : vector<16x256xf32>
    %127 = arith.addf %120, %126 : vector<16x256xf32>
    %128 = vector.extract_strided_slice %79 {offsets = [0, 16], sizes = [16, 240], strides = [1, 1]} : vector<16x256xf32> to vector<16x240xf32>
    %129 = vector.extract_strided_slice %79 {offsets = [0, 0], sizes = [16, 16], strides = [1, 1]} : vector<16x256xf32> to vector<16x16xf32>
    %130 = tpu.concatenate %128, %129 in 1 : vector<16x240xf32>, vector<16x16xf32> -> vector<16x256xf32>
    %c6_48 = arith.constant 6 : index
    %c0_49 = arith.constant 0 : index
    %c0_50 = arith.constant 0 : index
    %131 = vector.load %arg7[%c6_48, %c0_49, %c0_50] : memref<8x16x256xf32, #tpu.memory_space<vmem>>, vector<1x16x256xf32>
    %132 = vector.shape_cast %131 : vector<1x16x256xf32> to vector<16x256xf32>
    %133 = arith.mulf %130, %132 : vector<16x256xf32>
    %134 = arith.addf %127, %133 : vector<16x256xf32>
    %135 = vector.extract_strided_slice %79 {offsets = [0, 17], sizes = [16, 239], strides = [1, 1]} : vector<16x256xf32> to vector<16x239xf32>
    %136 = vector.extract_strided_slice %79 {offsets = [0, 0], sizes = [16, 17], strides = [1, 1]} : vector<16x256xf32> to vector<16x17xf32>
    %137 = tpu.concatenate %135, %136 in 1 : vector<16x239xf32>, vector<16x17xf32> -> vector<16x256xf32>
    %c7_51 = arith.constant 7 : index
    %c0_52 = arith.constant 0 : index
    %c0_53 = arith.constant 0 : index
    %138 = vector.load %arg7[%c7_51, %c0_52, %c0_53] : memref<8x16x256xf32, #tpu.memory_space<vmem>>, vector<1x16x256xf32>
    %139 = vector.shape_cast %138 : vector<1x16x256xf32> to vector<16x256xf32>
    %140 = arith.mulf %137, %139 : vector<16x256xf32>
    %141 = arith.addf %134, %140 : vector<16x256xf32>
    %142 = arith.addf %141, %5 : vector<16x256xf32>
    %c0_54 = arith.constant 0 : index
    %c0_55 = arith.constant 0 : index
    %c0_56 = arith.constant 0 : index
    %143 = vector.load %arg8[%c0_54, %c0_55, %c0_56] : memref<1x16x256xf32, #tpu.memory_space<vmem>>, vector<1x16x256xf32>
    %144 = vector.shape_cast %143 : vector<1x16x256xf32> to vector<16x256xf32>
    %145 = vector.shape_cast %142 : vector<16x256xf32> to vector<1x16x256xf32>
    tpu.vector_store %arg8[%c0_54, %c0_55, %c0_56], %145 {strides = array<i32>} : memref<1x16x256xf32, #tpu.memory_space<vmem>>, vector<1x16x256xf32>,
    return
  }
  func.func @transform_0(%arg0: i32) -> (i32, i32, i32) {
    %c0_i32 = arith.constant 0 : i32
    %c0_i32_0 = arith.constant 0 : i32
    %c0_i32_1 = arith.constant 0 : i32
    return %arg0, %c0_i32, %c0_i32_0 : i32, i32, i32
  }
  func.func @transform_1(%arg0: i32) -> (i32, i32) {
    %c0_i32 = arith.constant 0 : i32
    %c0_i32_0 = arith.constant 0 : i32
    %c0_i32_1 = arith.constant 0 : i32
    return %c0_i32, %c0_i32_0 : i32, i32
  }
  func.func @transform_2(%arg0: i32) -> (i32, i32) {
    %c0_i32 = arith.constant 0 : i32
    %c0_i32_0 = arith.constant 0 : i32
    %c0_i32_1 = arith.constant 0 : i32
    return %c0_i32, %c0_i32_0 : i32, i32
  }
  func.func @transform_3(%arg0: i32) -> (i32, i32, i32) {
    %c0_i32 = arith.constant 0 : i32
    %c0_i32_0 = arith.constant 0 : i32
    %c0_i32_1 = arith.constant 0 : i32
    %c0_i32_2 = arith.constant 0 : i32
    return %c0_i32, %c0_i32_0, %c0_i32_1 : i32, i32, i32
  }
  func.func @transform_4(%arg0: i32) -> (i32, i32) {
    %c0_i32 = arith.constant 0 : i32
    %c0_i32_0 = arith.constant 0 : i32
    %c0_i32_1 = arith.constant 0 : i32
    return %c0_i32, %c0_i32_0 : i32, i32
  }
  func.func @transform_5(%arg0: i32) -> (i32, i32) {
    %c0_i32 = arith.constant 0 : i32
    %c0_i32_0 = arith.constant 0 : i32
    %c0_i32_1 = arith.constant 0 : i32
    return %c0_i32, %c0_i32_0 : i32, i32
  }
  func.func @transform_6(%arg0: i32) -> (i32, i32, i32) {
    %c0_i32 = arith.constant 0 : i32
    %c0_i32_0 = arith.constant 0 : i32
    %c0_i32_1 = arith.constant 0 : i32
    %c0_i32_2 = arith.constant 0 : i32
    return %c0_i32, %c0_i32_0, %c0_i32_1 : i32, i32, i32
  }
  func.func @transform_7(%arg0: i32) -> (i32, i32, i32) {
    %c0_i32 = arith.constant 0 : i32
    %c0_i32_0 = arith.constant 0 : i32
    %c0_i32_1 = arith.constant 0 : i32
    return %arg0, %c0_i32, %c0_i32_0 : i32, i32, i32
  }
}

</mosaic_0001>

<bundles_post_ra>
// kernel: repghost_bottleneck.1
= control target key start
LH: loop header
LB: loop body
LE: loop exit
PB: predicated region body
PF: predicated region fallthrough
CT: control target
= control target key end

     0   :  { %s1627_s24 = smov 0   ;;  %s2433_s0 = inlined_call_operand.vmem [shape: f32[2,16,256], index: 0, kind: input, shape index: {}]   ;;  %s2434_s1 = inlined_call_operand.vmem [shape: f32[32,16], index: 1, kind: input, shape index: {}]   ;;  %s2435_s2 = inlined_call_operand.vmem [shape: f32[32,3], index: 2, kind: input, shape index: {}]   ;;  %s2436_s3 = inlined_call_operand.vmem [shape: f32[8,32,256], index: 3, kind: input, shape index: {}]   ;;  %s2437_s4 = inlined_call_operand.vmem [shape: f32[16,32], index: 4, kind: input, shape index: {}]   ;;  %s2438_s5 = inlined_call_operand.vmem [shape: f32[16,3], index: 5, kind: input, shape index: {}]   ;;  %s2439_s6 = inlined_call_operand.vmem [shape: f32[8,16,256], index: 6, kind: input, shape index: {}]   ;;  %s2440_s7 = inlined_call_operand.vmem [shape: f32[2,16,256], index: 7, kind: output, shape index: {}]  }
   0x1 LB: > { %s1415_s25 = sadd.s32 4294967295, %s1573_s24   ;;  %p1419_p0 = scmp.ge.s32.totalorder %s1573_s24, 1  ;;  %s1573_s24 = sphi %s1627_s24, %s17_s24  }
   0x2   : > { %p237_p1 = scmp.lt.s32.totalorder %s1573_s24, 3 }
   0x4   : > { %p238_p2 = pnand %p1419_p0, %p237_p1 }
   0x5   : > { %p269_p3 = scmp.lt.s32.totalorder (!%p238_p2), %s1415_s25, 1  ;;  %v1575_v0 = vmov (!%p238_p2), 0.0   ;;  %v283_v1 = vld [vmem:[%s2435_s2] sm:$0xff] (!%p238_p2)  ;;  %v1576_v2 = vmov (!%p238_p2), 1   ;;  %v1577_v3 = vmov (!%p238_p2), 0   ;;  %v285_v4 = vld [vmem:[%s2435_s2 + $0x10] sm:$0xff] (!%p238_p2) }
   0x6   : > { %241 = sbr.rel (%p238_p2) target bundleno = 890 (0x37a), region = 48  ;;  %392 = vmatprep.mubr.f32.mxu0 (!%p238_p2), %v1575_v0  ;;  %1064 = vmatprep.mubr.f32.mxu1 (!%p238_p2), %v1575_v0  ;;  %v286_v5 = vld [vmem:[%s2435_s2 + $0x18] sm:$0xff] (!%p238_p2)  ;;  %v284_v6 = vld [vmem:[%s2435_s2 + $0x8] sm:$0xff] (!%p238_p2)  ;;  %v1578_v12 = vmov (!%p238_p2), 2   ;;  %v279_v14 = vld [vmem:[%s2434_s1] sm:$0xff] (!%p238_p2)  ;;  %vm315_vm0 = vcmask (!%p238_p2), 130048  }
   0x7   : > { %1551 = vset.pattern.permute.xlu0 (!%p238_p2), %v1576_v2  ;;  %1550 = vset.pattern.permute.xlu1 (!%p238_p2), %v1577_v3  ;;  %v280_v15 = vld [vmem:[%s2434_s1 + $0x8] sm:$0xff] (!%p238_p2)  ;;  %v281_v16 = vld [vmem:[%s2434_s1 + $0x10] sm:$0xff] (!%p238_p2)  ;;  %v282_v17 = vld [vmem:[%s2434_s1 + $0x18] sm:$0xff] (!%p238_p2)  ;;  %s1579_s23 = smov (!%p238_p2), 17   ;;  %s1580_s26 = smov (!%p238_p2), 127   ;;  %vm501_vm1 = vcmask (!%p238_p2), 138240  }
   0x8   : > { %426 = vperm.xlu0 (!%p238_p2), %1551, %v283_v1   ;;  %307 = vperm.xlu1 (!%p238_p2), %1550, %v285_v4   ;;  %s1581_s27 = smov (!%p238_p2), 16   ;;  %s1582_s28 = smov (!%p238_p2), 113   ;;  %v289_v60 = vld [vmem:[%s2438_s5] sm:$0xff] (!%p238_p2)  ;;  %v290_v63 = vld [vmem:[%s2438_s5 + $0x8] sm:$0xff] (!%p238_p2)  ;;  %vm623_vm2 = vcmask (!%p238_p2), 121856   ;;  %vm743_vm3 = vcmask (!%p238_p2), 1039360  }
   0x9   : > { %s1583_s29 = smov (!%p238_p2), 15   ;;  %s1584_s8 = smov (!%p238_p2), 112   ;;  %vm805_vm4 = vcmask (!%p238_p2), 924672   ;;  %vm867_vm5 = vcmask (!%p238_p2), 916480   ;;  %vm685_vm6 = vcmask (!%p238_p2), 7168   ;;  %vm929_vm7 = vcmask (!%p238_p2), 908288  }
   0xa   : > { %s1585_s9 = smov (!%p238_p2), 1   ;;  %s1586_s10 = smov (!%p238_p2), 111   ;;  %vm993_vm8 = vcmask (!%p238_p2), 261120  }
   0xc   : > { %1554 = vset.pattern.permute.xlu0 (!%p238_p2), %v1578_v12  ;;  %312 = vperm.xlu1 (!%p238_p2), %1550, %v286_v5  }
   0xd   : > { %s2442_s25 = smov (!%p269_p3, %s1415_s25), 1  ;;  %454 = vperm.xlu0 %1554, %v284_v6  }
   0xe   : > { %s1516_s30 = sshll.u32 %s2442_s25, 5 }
   0xf   : > { %s1655_s12 = scalar_lea.vmem %s2433_s0, %s1516_s30 }
  0x10   : > { %v292_v7 = vld [vmem:[%s1655_s12 + $0x8] sm:$0xff]  ;;  %v294_v8 = vld [vmem:[%s1655_s12 + $0x18] sm:$0xff]  ;;  %v291_v9 = vld [vmem:[%s1655_s12] sm:$0xff]  ;;  %1552 = vset.pattern.permute.xlu1 %v1576_v2 }
  0x11   : > { %v1518_v10 = vpack.c.bf16 %v294_v8, %v292_v7  ;;  %v293_v11 = vld [vmem:[%s1655_s12 + $0x10] sm:$0xff]  ;;  %458 = vperm.xlu0 %1554, %v285_v4   ;;  %430 = vperm.xlu1 %1552, %v284_v6  }
  0x12   : > { %v1520_v13 = vpack.c.bf16 %v293_v11, %v291_v9 }
  0x13   : > { %1519 = vmatprep.subr.bf16.mxu0 %v1518_v10 }
  0x14   : > { %1521 = vmatpush1.bf16.msra.mxu0 %v1520_v13 }
  0x15   : > { %1556 = vset.pattern.permute.xlu0 %v1577_v3  ;;  %1553 = vset.pattern.permute.xlu1 %v1578_v12 }
  0x16   : > { %297 = vperm.xlu0 %1556, %v283_v1   ;;  %450 = vperm.xlu1 %1553, %v283_v1  }
  0x17   : > { %1424 = vmatmul.mubr.msk.f32.vlgmr.msra.gmra.mrb[0].mxu0 %vm315_vm0, %v279_v14  ;;  %v518_v14 = vld [vmem:[%s2436_s3] sm:$0xff] }
  0x18   : > { %398 = vmatprep.mubr.f32.mxu0 %v1575_v0 }
  0x1a   : > { %302 = vperm.xlu0 %1556, %v284_v6   ;;  %1555 = vset.pattern.permute.xlu1 %v1576_v2 }
  0x1b   : > { %1425 = vmatmul.mubr.msk.f32.gmra.mrb[2].mxu0 %vm315_vm0, %v280_v15  ;;  %434 = vperm.xlu1 %1555, %v285_v4  }
  0x1c   : > { %404 = vmatprep.mubr.f32.mxu0 %v1575_v0 }
  0x1f   : > { %1426 = vmatmul.mubr.msk.f32.gmra.mrb[4].mxu0 %vm315_vm0, %v281_v16  ;;  %438 = vperm.xlu1 %1555, %v286_v5  }
  0x20   : > { %410 = vmatprep.mubr.f32.mxu0 %v1575_v0 }
  0x23   : > { %1427 = vmatmul.mubr.msk.f32.gmra.mrb[6].mxu0 %vm315_vm0, %v282_v17  ;;  %1557 = vset.pattern.permute.xlu1 %v1578_v12 }
  0x24   : > { %462 = vperm.xlu1 %1557, %v286_v5  }
  0x28   : > { %1558 = vset.pattern.permute.xlu1 %v1577_v3 }
  0x87   : > { %v1688_v18 = vpop.permute.xlu0 %426  ;;  %v308_v39 = vpop.permute.xlu1 %307 }
  0x8b   : > { %v313_v44 = vpop.permute.xlu1 %312 }
  0x8c   : > { %v1690_v19 = vpop.permute.xlu0 %454 }
  0x90   : > { %v1692_v20 = vpop.permute.xlu0 %458  ;;  %v1800_v47 = vpop.permute.xlu1 %430 }
  0x95   : > { %v298_v21 = vpop.permute.xlu0 %297  ;;  %v1810_v50 = vpop.permute.xlu1 %450 }
  0x99   : > { %v303_v34 = vpop.permute.xlu0 %302 }
  0x9a   : > { %v1816_v51 = vpop.permute.xlu1 %434 }
  0x9e   : > { %v1822_v52 = vpop.permute.xlu1 %438 }
  0xa3   : > { %v1830_v53 = vpop.permute.xlu1 %462 }
  0xea   : > { %v394_v22 = vpop.f32.mrb[0].mxu0 }
  0xeb   : > { %v395_v23 = vadd.f32 %v394_v22, %v298_v21  ;;  %v396_v24 = vpop.f32.mrb[1].mxu0 }
  0xec   : > { %v397_v25 = vadd.f32 %v396_v24, %v298_v21 }
  0xed   : > { %v1694_v26 = vmax.f32 %v395_v23, 0.0  ;;  %v1429_v23 = vld [vmem:[%s2436_s3 + $0x48] sm:$0xff] }
  0xee   : > { %v1696_v27 = vmax.f32 %v397_v25, 0.0  ;;  %v400_v28 = vpop.f32.mrb[2].mxu0 }
  0xef   : > { %v402_v29 = vpop.f32.mrb[3].mxu0  ;;  %493 = vrot.lane.b32.xlu0 %v1694_v26, %s1579_s23  ;;  %v401_v35 = vadd.f32 %v400_v28, %v303_v34  ;;  %v441_v11 = vmul.f32 %v1688_v18, %v1694_v26 }
  0xf0   : > { %729 = vrot.lane.b32.xlu1 %v1696_v27, %s1580_s26  ;;  %v403_v37 = vadd.f32 %v402_v29, %v303_v34  ;;  %v442_v13 = vmul.f32 %v1688_v18, %v1696_v27  ;;  %v1428_v18 = vld [vmem:[%s2436_s3 + $0x40] sm:$0xff] }
  0xf1   : > { %v1714_v36 = vmax.f32 %v401_v35, 0.0  ;;  %v465_v29 = vadd.f32 %v1810_v50, %v441_v11 }
  0xf2   : > { %v406_v30 = vpop.f32.mrb[4].mxu0  ;;  %v1732_v38 = vmax.f32 %v403_v37, 0.0 }
  0xf3   : > { %v408_v31 = vpop.f32.mrb[5].mxu0  ;;  %554 = vrot.lane.b32.xlu0 %v1694_v26, %s1581_s27  ;;  %v407_v40 = vadd.f32 %v406_v30, %v308_v39  ;;  %v443_v17 = vmul.f32 %v1800_v47, %v1714_v36  ;;  %v466_v30 = vadd.f32 %v1810_v50, %v442_v13 }
  0xf4   : > { %791 = vrot.lane.b32.xlu1 %v1696_v27, %s1582_s28  ;;  %v409_v41 = vadd.f32 %v408_v31, %v308_v39  ;;  %v444_v21 = vmul.f32 %v1800_v47, %v1732_v38  ;;  %v1436_v31 = vld [vmem:[%s2436_s3 + $0x80] sm:$0xff] }
  0xf5   : > { %v1766_v42 = vmax.f32 %v407_v40, 0.0 }
  0xf6   : > { %v412_v32 = vpop.f32.mrb[6].mxu0  ;;  %v1768_v43 = vmax.f32 %v409_v41, 0.0  ;;  %v1916_v34 = vadd.f32 %v1690_v19, %v444_v21  ;;  %v1430_v21 = vld [vmem:[%s2436_s3 + $0x50] sm:$0xff] }
  0xf7   : > { %615 = vrot.lane.b32.xlu0 %v1694_v26, %s1583_s29  ;;  %v414_v33 = vpop.f32.mrb[7].mxu0  ;;  %v413_v45 = vadd.f32 %v412_v32, %v313_v44  ;;  %v1437_v32 = vld [vmem:[%s2436_s3 + $0x88] sm:$0xff] }
  0xf8   : > { %853 = vrot.lane.b32.xlu1 %v1696_v27, %s1584_s8  ;;  %v415_v48 = vadd.f32 %v414_v33, %v313_v44  ;;  %v1913_v33 = vadd.f32 %v1690_v19, %v443_v17  ;;  %v1461_v17 = vld [vmem:[%s2436_s3 + $0x148] sm:$0xff] }
  0xf9   : > { %v1786_v46 = vmax.f32 %v413_v45, 0.0 }
  0xfa   : > { %v1806_v49 = vmax.f32 %v415_v48, 0.0  ;;  %v1452_v48 = vld [vmem:[%s2436_s3 + $0x100] sm:$0xff] }
  0xfb   : > { %677 = vrot.lane.b32.xlu0 %v1694_v26, %s1585_s9 }
  0xfc   : > { %915 = vrot.lane.b32.xlu1 %v1696_v27, %s1586_s10 }
  0xff   : > { %727 = vrot.lane.b32.xlu0 %v1694_v26, %s1580_s26 }
 0x100   : > { %495 = vrot.lane.b32.xlu1 %v1714_v36, %s1579_s23 }
 0x103   : > { %789 = vrot.lane.b32.xlu0 %v1694_v26, %s1582_s28 }
 0x104   : > { %556 = vrot.lane.b32.xlu1 %v1714_v36, %s1581_s27 }
 0x107   : > { %851 = vrot.lane.b32.xlu0 %v1694_v26, %s1584_s8 }
 0x108   : > { %617 = vrot.lane.b32.xlu1 %v1714_v36, %s1583_s29 }
 0x10b   : > { %913 = vrot.lane.b32.xlu0 %v1694_v26, %s1586_s10 }
 0x10c   : > { %679 = vrot.lane.b32.xlu1 %v1714_v36, %s1585_s9 }
 0x10f   : > { %477 = vrot.lane.b32.xlu0 %v1696_v27, %s1579_s23 }
 0x110   : > { %479 = vrot.lane.b32.xlu1 %v1732_v38, %s1579_s23 }
 0x113   : > { %542 = vrot.lane.b32.xlu0 %v1696_v27, %s1581_s27 }
 0x114   : > { %544 = vrot.lane.b32.xlu1 %v1732_v38, %s1581_s27 }
 0x117   : > { %603 = vrot.lane.b32.xlu0 %v1696_v27, %s1583_s29 }
 0x118   : > { %605 = vrot.lane.b32.xlu1 %v1732_v38, %s1583_s29 }
 0x11b   : > { %665 = vrot.lane.b32.xlu0 %v1696_v27, %s1585_s9 }
 0x11c   : > { %667 = vrot.lane.b32.xlu1 %v1732_v38, %s1585_s9 }
 0x11f   : > { %731 = vrot.lane.b32.xlu0 %v1714_v36, %s1580_s26 }
 0x120   : > { %733 = vrot.lane.b32.xlu1 %v1732_v38, %s1580_s26 }
 0x123   : > { %793 = vrot.lane.b32.xlu0 %v1714_v36, %s1582_s28 }
 0x124   : > { %795 = vrot.lane.b32.xlu1 %v1732_v38, %s1582_s28 }
 0x127   : > { %855 = vrot.lane.b32.xlu0 %v1714_v36, %s1584_s8 }
 0x128   : > { %857 = vrot.lane.b32.xlu1 %v1732_v38, %s1584_s8 }
 0x12b   : > { %917 = vrot.lane.b32.xlu0 %v1714_v36, %s1586_s10 }
 0x12c   : > { %919 = vrot.lane.b32.xlu1 %v1732_v38, %s1586_s10 }
 0x12f   : > { %497 = vrot.lane.b32.xlu0 %v1766_v42, %s1579_s23 }
 0x130   : > { %737 = vrot.lane.b32.xlu1 %v1768_v43, %s1580_s26 }
 0x133   : > { %558 = vrot.lane.b32.xlu0 %v1766_v42, %s1581_s27 }
 0x134   : > { %799 = vrot.lane.b32.xlu1 %v1768_v43, %s1582_s28 }
 0x137   : > { %619 = vrot.lane.b32.xlu0 %v1766_v42, %s1583_s29 }
 0x138   : > { %861 = vrot.lane.b32.xlu1 %v1768_v43, %s1584_s8 }
 0x13b   : > { %681 = vrot.lane.b32.xlu0 %v1766_v42, %s1585_s9 }
 0x13c   : > { %923 = vrot.lane.b32.xlu1 %v1768_v43, %s1586_s10 }
 0x13f   : > { %735 = vrot.lane.b32.xlu0 %v1766_v42, %s1580_s26 }
 0x140   : > { %499 = vrot.lane.b32.xlu1 %v1786_v46, %s1579_s23 }
 0x143   : > { %797 = vrot.lane.b32.xlu0 %v1766_v42, %s1582_s28 }
 0x144   : > { %560 = vrot.lane.b32.xlu1 %v1786_v46, %s1581_s27 }
 0x147   : > { %859 = vrot.lane.b32.xlu0 %v1766_v42, %s1584_s8 }
 0x148   : > { %621 = vrot.lane.b32.xlu1 %v1786_v46, %s1583_s29 }
 0x14b   : > { %921 = vrot.lane.b32.xlu0 %v1766_v42, %s1586_s10 }
 0x14c   : > { %683 = vrot.lane.b32.xlu1 %v1786_v46, %s1585_s9 }
 0x14f   : > { %481 = vrot.lane.b32.xlu0 %v1768_v43, %s1579_s23 }
 0x150   : > { %483 = vrot.lane.b32.xlu1 %v1806_v49, %s1579_s23 }
 0x153   : > { %546 = vrot.lane.b32.xlu0 %v1768_v43, %s1581_s27 }
 0x154   : > { %548 = vrot.lane.b32.xlu1 %v1806_v49, %s1581_s27 }
 0x157   : > { %607 = vrot.lane.b32.xlu0 %v1768_v43, %s1583_s29 }
 0x158   : > { %609 = vrot.lane.b32.xlu1 %v1806_v49, %s1583_s29 }
 0x15b   : > { %669 = vrot.lane.b32.xlu0 %v1768_v43, %s1585_s9 }
 0x15c   : > { %671 = vrot.lane.b32.xlu1 %v1806_v49, %s1585_s9 }
 0x15f   : > { %739 = vrot.lane.b32.xlu0 %v1786_v46, %s1580_s26 }
 0x160   : > { %741 = vrot.lane.b32.xlu1 %v1806_v49, %s1580_s26 }
 0x161   : > { %v494_v54 = vpop.permute.xlu0 %493 }
 0x162   : > { %v1836_v55 = vpop.permute.xlu1 %729 }
 0x163   : > { %801 = vrot.lane.b32.xlu0 %v1786_v46, %s1582_s28 }
 0x164   : > { %803 = vrot.lane.b32.xlu1 %v1806_v49, %s1582_s28 }
 0x165   : > { %v555_v56 = vpop.permute.xlu0 %554 }
 0x166   : > { %v1842_v57 = vpop.permute.xlu1 %791 }
 0x167   : > { %863 = vrot.lane.b32.xlu0 %v1786_v46, %s1584_s8 }
 0x168   : > { %865 = vrot.lane.b32.xlu1 %v1806_v49, %s1584_s8 }
 0x169   : > { %v616_v58 = vpop.permute.xlu0 %615 }
 0x16a   : > { %v1848_v59 = vpop.permute.xlu1 %853 }
 0x16b   : > { %925 = vrot.lane.b32.xlu0 %v1786_v46, %s1586_s10 }
 0x16c   : > { %927 = vrot.lane.b32.xlu1 %v1806_v49, %s1586_s10 }
 0x16d   : > { %v1857_v61 = vpop.permute.xlu0 %677 }
 0x16e   : > { %v1859_v62 = vpop.permute.xlu1 %915 }
 0x16f   : > { %985 = vperm.xlu0 %1556, %v289_v60  }
 0x170   : > { %990 = vperm.xlu1 %1558, %v290_v63  }
 0x171   : > { %v728_v1 = vpop.permute.xlu0 %727 }
 0x172   : > { %v1864_v3 = vpop.permute.xlu1 %495  ;;  %v744_v19 = vsel %vm743_vm3, %v728_v1, %v1836_v55  ;;  %v760_v50 = vsel %vm743_vm3, %v1836_v55, %v728_v1  ;;  %v520_v55 = vld [vmem:[%s2436_s3 + $0x10] sm:$0xff] }
 0x173   : > { %1560 = vset.pattern.permute.xlu0 %v1576_v2 }
 0x174   : > { %1082 = vperm.xlu0 %1560, %v290_v63   ;;  %1559 = vset.pattern.permute.xlu1 %v1576_v2 }
 0x175   : > { %v790_v4 = vpop.permute.xlu0 %789  ;;  %1078 = vperm.xlu1 %1559, %v289_v60  }
 0x176   : > { %v1868_v5 = vpop.permute.xlu1 %556 }
 0x178   : > { %1562 = vset.pattern.permute.xlu0 %v1578_v12 }
 0x179   : > { %v1871_v6 = vpop.permute.xlu0 %851  ;;  %1561 = vset.pattern.permute.xlu1 %v1578_v12  ;;  %v519_v12 = vld [vmem:[%s2436_s3 + $0x8] sm:$0xff] }
 0x17a   : > { %v1873_v7 = vpop.permute.xlu1 %617  ;;  %1090 = vperm.xlu1 %1561, %v289_v60   ;;  %v1445_v60 = vld [vmem:[%s2436_s3 + $0xc8] sm:$0xff] }
 0x17d   : > { %v1876_v8 = vpop.permute.xlu0 %913 }
 0x17e   : > { %v1878_v9 = vpop.permute.xlu1 %679  ;;  %1094 = vperm.xlu1 %1561, %v290_v63   ;;  %v1453_v63 = vld [vmem:[%s2436_s3 + $0x108] sm:$0xff] }
 0x181   : > { %v478_v10 = vpop.permute.xlu0 %477 }
 0x182   : > { %v480_v2 = vpop.permute.xlu1 %479  ;;  %v502_v15 = vsel %vm501_vm1, %v494_v54, %v478_v10  ;;  %v514_v16 = vsel %vm501_vm1, %v478_v10, %v494_v54  ;;  %v806_v54 = vsel %vm805_vm4, %v790_v4, %v1842_v57 }
 0x183   : > { %v526_v27 = vmul.f32 %v518_v14, %v514_v16  ;;  %v527_v28 = vmul.f32 %v519_v12, %v502_v15  ;;  %v503_v1 = vsel %vm501_vm1, %v1864_v3, %v480_v2  ;;  %v1460_v14 = vld [vmem:[%s2436_s3 + $0x140] sm:$0xff] }
 0x185   : > { %v543_v22 = vpop.permute.xlu0 %542  ;;  %v534_v41 = vadd.f32 %v526_v27, %v465_v29  ;;  %v535_v44 = vadd.f32 %v527_v28, %v466_v30  ;;  %v1438_v28 = vld [vmem:[%s2436_s3 + $0x90] sm:$0xff]  ;;  %v1439_v29 = vld [vmem:[%s2436_s3 + $0x98] sm:$0xff] }
 0x186   : > { %v562_v24 = vsel %vm315_vm0, %v555_v56, %v543_v22  ;;  %v574_v25 = vsel %vm315_vm0, %v543_v22, %v555_v56  ;;  %v545_v26 = vpop.permute.xlu1 %544  ;;  %v822_v56 = vsel %vm805_vm4, %v1842_v57, %v790_v4  ;;  %v521_v57 = vld [vmem:[%s2436_s3 + $0x18] sm:$0xff]  ;;  %v515_v4 = vsel %vm501_vm1, %v480_v2, %v1864_v3 }
 0x187   : > { %v587_v35 = vmul.f32 %v1428_v18, %v574_v25  ;;  %v588_v36 = vmul.f32 %v1429_v23, %v562_v24  ;;  %v563_v12 = vsel %vm315_vm0, %v1868_v5, %v545_v26  ;;  %v575_v15 = vsel %vm315_vm0, %v545_v26, %v1868_v5  ;;  %v1431_v22 = vld [vmem:[%s2436_s3 + $0x58] sm:$0xff] }
 0x188   : > { %v773_v25 = vmul.f32 %v1452_v48, %v744_v19  ;;  %v774_v26 = vmul.f32 %v1453_v63, %v760_v50  ;;  %v529_v27 = vmul.f32 %v521_v57, %v503_v1  ;;  %v1446_v48 = vld [vmem:[%s2436_s3 + $0xd0] sm:$0xff]  ;;  %v1447_v19 = vld [vmem:[%s2436_s3 + $0xd8] sm:$0xff]  ;;  %v884_v63 = vsel %vm867_vm5, %v1848_v59, %v1871_v6  ;;  %v1468_v1 = vld [vmem:[%s2436_s3 + $0x180] sm:$0xff] }
 0x189   : > { %v604_v37 = vpop.permute.xlu0 %603  ;;  %v595_v10 = vadd.f32 %v587_v35, %v534_v41  ;;  %v596_v11 = vadd.f32 %v588_v36, %v535_v44  ;;  %v590_v41 = vmul.f32 %v1431_v22, %v563_v12  ;;  %v1463_v12 = vld [vmem:[%s2436_s3 + $0x158] sm:$0xff] }
 0x18a   : > { %v624_v38 = vsel %vm623_vm2, %v616_v58, %v604_v37  ;;  %v636_v39 = vsel %vm623_vm2, %v604_v37, %v616_v58  ;;  %v606_v40 = vpop.permute.xlu1 %605  ;;  %v1444_v58 = vld [vmem:[%s2436_s3 + $0xc0] sm:$0xff]  ;;  %v835_v37 = vmul.f32 %v1460_v14, %v806_v54  ;;  %v537_v54 = vadd.f32 %v529_v27, %v1916_v34  ;;  %v1462_v14 = vld [vmem:[%s2436_s3 + $0x150] sm:$0xff]  ;;  %v1471_v27 = vld [vmem:[%s2436_s3 + $0x198] sm:$0xff] }
 0x18b   : > { %v649_v45 = vmul.f32 %v1436_v31, %v636_v39  ;;  %v650_v47 = vmul.f32 %v1437_v32, %v624_v38  ;;  %v625_v30 = vsel %vm623_vm2, %v1873_v7, %v606_v40  ;;  %v637_v31 = vsel %vm623_vm2, %v606_v40, %v1873_v7 }
 0x18c   : > { %v836_v38 = vmul.f32 %v1461_v17, %v822_v56  ;;  %v589_v39 = vmul.f32 %v1430_v21, %v575_v15  ;;  %v651_v56 = vmul.f32 %v1438_v28, %v637_v31  ;;  %v1476_v28 = vld [vmem:[%s2436_s3 + $0x1c0] sm:$0xff] }
 0x18d   : > { %v666_v13 = vpop.permute.xlu0 %665  ;;  %v657_v5 = vadd.f32 %v649_v45, %v595_v10  ;;  %v658_v18 = vadd.f32 %v650_v47, %v596_v11 }
 0x18e   : > { %v686_v16 = vsel %vm685_vm6, %v1857_v61, %v666_v13  ;;  %v698_v3 = vsel %vm685_vm6, %v666_v13, %v1857_v61  ;;  %v668_v2 = vpop.permute.xlu1 %667  ;;  %v528_v61 = vmul.f32 %v520_v55, %v515_v4  ;;  %v1454_v55 = vld [vmem:[%s2436_s3 + $0x110] sm:$0xff]  ;;  %v598_v4 = vadd.f32 %v590_v41, %v537_v54 }
 0x18f   : > { %v711_v23 = vmul.f32 %v1444_v58, %v698_v3  ;;  %v712_v24 = vmul.f32 %v1445_v60, %v686_v16  ;;  %v687_v7 = vsel %vm685_vm6, %v1878_v9, %v668_v2  ;;  %v699_v40 = vsel %vm685_vm6, %v668_v2, %v1878_v9  ;;  %v1455_v9 = vld [vmem:[%s2436_s3 + $0x118] sm:$0xff] }
 0x190   : > { %v536_v50 = vadd.f32 %v528_v61, %v1913_v33  ;;  %v652_v58 = vmul.f32 %v1439_v29, %v625_v30  ;;  %v868_v60 = vsel %vm867_vm5, %v1871_v6, %v1848_v59  ;;  %v1469_v59 = vld [vmem:[%s2436_s3 + $0x188] sm:$0xff]  ;;  %v713_v10 = vmul.f32 %v1446_v48, %v699_v40  ;;  %v1470_v61 = vld [vmem:[%s2436_s3 + $0x190] sm:$0xff]  ;;  %v1479_v40 = vld [vmem:[%s2436_s3 + $0x1d8] sm:$0xff] }
 0x191   : > { %v719_v32 = vadd.f32 %v711_v23, %v657_v5  ;;  %v720_v35 = vadd.f32 %v712_v24, %v658_v18  ;;  %v732_v36 = vpop.permute.xlu0 %731  ;;  %v714_v11 = vmul.f32 %v1447_v19, %v687_v7  ;;  %v897_v18 = vmul.f32 %v1468_v1, %v868_v60  ;;  %v1477_v29 = vld [vmem:[%s2436_s3 + $0x1c8] sm:$0xff]  ;;  %v1478_v7 = vld [vmem:[%s2436_s3 + $0x1d0] sm:$0xff] }
 0x192   : > { %v734_v44 = vpop.permute.xlu1 %733  ;;  %v597_v6 = vadd.f32 %v589_v39, %v536_v50  ;;  %v660_v21 = vadd.f32 %v652_v58, %v598_v4  ;;  %v898_v23 = vmul.f32 %v1469_v59, %v884_v63  ;;  %v930_v24 = vsel %vm929_vm7, %v1876_v8, %v1859_v62 }
 0x193   : > { %v781_v45 = vadd.f32 %v773_v25, %v719_v32  ;;  %v782_v47 = vadd.f32 %v774_v26, %v720_v35  ;;  %v745_v33 = vsel %vm743_vm3, %v732_v36, %v734_v44  ;;  %v761_v34 = vsel %vm743_vm3, %v734_v44, %v732_v36 }
 0x194   : > { %v659_v17 = vadd.f32 %v651_v56, %v597_v6  ;;  %v775_v22 = vmul.f32 %v1454_v55, %v745_v33  ;;  %v776_v5 = vmul.f32 %v1455_v9, %v761_v34  ;;  %v946_v25 = vsel %vm929_vm7, %v1859_v62, %v1876_v8 }
 0x195   : > { %v794_v57 = vpop.permute.xlu0 %793  ;;  %v844_v3 = vadd.f32 %v836_v38, %v782_v47  ;;  %v843_v2 = vadd.f32 %v835_v37, %v781_v45  ;;  %v722_v31 = vadd.f32 %v714_v11, %v660_v21  ;;  %v959_v47 = vmul.f32 %v1476_v28, %v930_v24 }
 0x196   : > { %v796_v13 = vpop.permute.xlu1 %795  ;;  %v721_v30 = vadd.f32 %v713_v10, %v659_v17  ;;  %v960_v48 = vmul.f32 %v1477_v29, %v946_v25 }
 0x197   : > { %v807_v15 = vsel %vm805_vm4, %v794_v57, %v796_v13  ;;  %v823_v16 = vsel %vm805_vm4, %v796_v13, %v794_v57  ;;  %v906_v37 = vadd.f32 %v898_v23, %v844_v3  ;;  %v905_v38 = vadd.f32 %v897_v18, %v843_v2 }
 0x198   : > { %v837_v62 = vmul.f32 %v1462_v14, %v807_v15  ;;  %v838_v8 = vmul.f32 %v1463_v12, %v823_v16  ;;  %v783_v39 = vadd.f32 %v775_v22, %v721_v30  ;;  %v784_v41 = vadd.f32 %v776_v5, %v722_v31  ;;  %v522_v30 = vld [vmem:[%s2436_s3 + $0x20] sm:$0xff]  ;;  %v523_v31 = vld [vmem:[%s2436_s3 + $0x28] sm:$0xff] }
 0x199   : > { %v856_v26 = vpop.permute.xlu0 %855  ;;  %v968_v63 = vadd.f32 %v960_v48, %v906_v37  ;;  %v967_v55 = vadd.f32 %v959_v47, %v905_v38  ;;  %v447_v37 = vmul.f32 %v1822_v52, %v1786_v46  ;;  %v448_v38 = vmul.f32 %v1822_v52, %v1806_v49  ;;  %v1440_v46 = vld [vmem:[%s2436_s3 + $0xa0] sm:$0xff]  ;;  %v1441_v49 = vld [vmem:[%s2436_s3 + $0xa8] sm:$0xff] }
 0x19a   : > { %v858_v32 = vpop.permute.xlu1 %857  ;;  %v845_v50 = vadd.f32 %v837_v62, %v783_v39  ;;  %v846_v54 = vadd.f32 %v838_v8, %v784_v41  ;;  %v1432_v39 = vld [vmem:[%s2436_s3 + $0x60] sm:$0xff]  ;;  %v1433_v41 = vld [vmem:[%s2436_s3 + $0x68] sm:$0xff] }
 0x19b   : > { %v869_v35 = vsel %vm867_vm5, %v856_v26, %v858_v32  ;;  %v885_v36 = vsel %vm867_vm5, %v858_v32, %v856_v26  ;;  %v976_v10 = vmax.f32 %v968_v63, 0.0  ;;  %v975_v13 = vmax.f32 %v967_v55, 0.0 }
 0x19c   : > { %v899_v44 = vmul.f32 %v1470_v61, %v869_v35  ;;  %v900_v45 = vmul.f32 %v1471_v27, %v885_v36  ;;  %v445_v32 = vmul.f32 %v1816_v51, %v1766_v42  ;;  %v446_v35 = vmul.f32 %v1816_v51, %v1768_v43 }
 0x19d   : > { %v918_v19 = vpop.permute.xlu0 %917 }
 0x19e   : > { %v920_v56 = vpop.permute.xlu1 %919  ;;  %v907_v9 = vadd.f32 %v899_v44, %v845_v50  ;;  %v908_v57 = vadd.f32 %v900_v45, %v846_v54  ;;  %v469_v52 = vadd.f32 %v1692_v20, %v445_v32  ;;  %v470_v47 = vadd.f32 %v1692_v20, %v446_v35  ;;  %v1456_v20 = vld [vmem:[%s2436_s3 + $0x120] sm:$0xff] }
 0x19f   : > { %v931_v58 = vsel %vm929_vm7, %v918_v19, %v920_v56  ;;  %v947_v60 = vsel %vm929_vm7, %v920_v56, %v918_v19  ;;  %v472_v50 = vadd.f32 %v1830_v53, %v448_v38  ;;  %v1443_v38 = vld [vmem:[%s2436_s3 + $0xb8] sm:$0xff] }
 0x1a0   : > { %v961_v33 = vmul.f32 %v1478_v7, %v931_v58  ;;  %v962_v34 = vmul.f32 %v1479_v40, %v947_v60  ;;  %v471_v40 = vadd.f32 %v1830_v53, %v447_v37  ;;  %v1442_v37 = vld [vmem:[%s2436_s3 + $0xb0] sm:$0xff] }
 0x1a1   : > { %v498_v1 = vpop.permute.xlu0 %497 }
 0x1a2   : > { %v738_v59 = vpop.permute.xlu1 %737  ;;  %v970_v6 = vadd.f32 %v962_v34, %v908_v57  ;;  %v969_v4 = vadd.f32 %v961_v33, %v907_v9 }
 0x1a4   : > { %v978_v11 = vmax.f32 %v970_v6, 0.0  ;;  %v977_v14 = vmax.f32 %v969_v4, 0.0  ;;  %v1449_v6 = vld [vmem:[%s2436_s3 + $0xe8] sm:$0xff] }
 0x1a5   : > { %v559_v12 = vpop.permute.xlu0 %558  ;;  %v1457_v4 = vld [vmem:[%s2436_s3 + $0x128] sm:$0xff] }
 0x1a6   : > { %v800_v15 = vpop.permute.xlu1 %799  ;;  %v1522_v16 = vpack.c.bf16 %v978_v11, %v976_v10  ;;  %v1524_v3 = vpack.c.bf16 %v977_v14, %v975_v13  ;;  %v525_v10 = vld [vmem:[%s2436_s3 + $0x38] sm:$0xff] }
 0x1a8   : > { %1523 = vmatprep.subr.bf16.mxu1 %v1522_v16  ;;  %v1464_v16 = vld [vmem:[%s2436_s3 + $0x160] sm:$0xff] }
 0x1a9   : > { %v620_v2 = vpop.permute.xlu0 %619  ;;  %1525 = vmatpush1.bf16.msra.mxu1 %v1524_v3 }
 0x1aa   : > { %v2048_v17 = vpop.permute.xlu1 %861 }
 0x1ad   : > { %v2050_v21 = vpop.permute.xlu0 %681 }
 0x1ae   : > { %v2052_v22 = vpop.permute.xlu1 %923 }
 0x1b1   : > { %v736_v5 = vpop.permute.xlu0 %735 }
 0x1b2   : > { %v500_v18 = vpop.permute.xlu1 %499  ;;  %v746_v33 = vsel %vm743_vm3, %v736_v5, %v738_v59  ;;  %v762_v34 = vsel %vm743_vm3, %v738_v59, %v736_v5  ;;  %v524_v59 = vld [vmem:[%s2436_s3 + $0x30] sm:$0xff] }
 0x1b3   : > { %v777_v32 = vmul.f32 %v1456_v20, %v746_v33  ;;  %v778_v35 = vmul.f32 %v1457_v4, %v762_v34  ;;  %v1458_v20 = vld [vmem:[%s2436_s3 + $0x130] sm:$0xff]  ;;  %v1472_v34 = vld [vmem:[%s2436_s3 + $0x1a0] sm:$0xff] }
 0x1b5   : > { %v798_v23 = vpop.permute.xlu0 %797 }
 0x1b6   : > { %v561_v24 = vpop.permute.xlu1 %560  ;;  %v808_v57 = vsel %vm805_vm4, %v798_v23, %v800_v15  ;;  %v824_v53 = vsel %vm805_vm4, %v800_v15, %v798_v23 }
 0x1b9   : > { %v2054_v25 = vpop.permute.xlu0 %859 }
 0x1ba   : > { %v2056_v26 = vpop.permute.xlu1 %621 }
 0x1bd   : > { %v2058_v61 = vpop.permute.xlu0 %921 }
 0x1be   : > { %v2060_v27 = vpop.permute.xlu1 %683 }
 0x1c1   : > { %v482_v28 = vpop.permute.xlu0 %481 }
 0x1c2   : > { %v484_v29 = vpop.permute.xlu1 %483  ;;  %v504_v62 = vsel %vm501_vm1, %v498_v1, %v482_v28  ;;  %v516_v8 = vsel %vm501_vm1, %v482_v28, %v498_v1  ;;  %v1448_v1 = vld [vmem:[%s2436_s3 + $0xe0] sm:$0xff] }
 0x1c3   : > { %v530_v51 = vmul.f32 %v522_v30, %v516_v8  ;;  %v531_v45 = vmul.f32 %v523_v31, %v504_v62  ;;  %v505_v11 = vsel %vm501_vm1, %v500_v18, %v484_v29  ;;  %v517_v13 = vsel %vm501_vm1, %v484_v29, %v500_v18  ;;  %v1465_v18 = vld [vmem:[%s2436_s3 + $0x168] sm:$0xff]  ;;  %v1434_v29 = vld [vmem:[%s2436_s3 + $0x70] sm:$0xff]  ;;  %v1435_v30 = vld [vmem:[%s2436_s3 + $0x78] sm:$0xff] }
 0x1c5   : > { %v547_v36 = vpop.permute.xlu0 %546  ;;  %v538_v60 = vadd.f32 %v530_v51, %v469_v52  ;;  %v539_v63 = vadd.f32 %v531_v45, %v470_v47  ;;  %v839_v51 = vmul.f32 %v1464_v16, %v808_v57  ;;  %v840_v45 = vmul.f32 %v1465_v18, %v824_v53 }
 0x1c6   : > { %v564_v42 = vsel %vm315_vm0, %v559_v12, %v547_v36  ;;  %v576_v44 = vsel %vm315_vm0, %v547_v36, %v559_v12  ;;  %v549_v43 = vpop.permute.xlu1 %548  ;;  %v533_v36 = vmul.f32 %v525_v10, %v505_v11  ;;  %v1466_v10 = vld [vmem:[%s2436_s3 + $0x170] sm:$0xff]  ;;  %v1467_v11 = vld [vmem:[%s2436_s3 + $0x178] sm:$0xff] }
 0x1c7   : > { %v591_v48 = vmul.f32 %v1432_v39, %v576_v44  ;;  %v592_v19 = vmul.f32 %v1433_v41, %v564_v42  ;;  %v565_v3 = vsel %vm315_vm0, %v561_v24, %v549_v43 }
 0x1c9   : > { %v608_v7 = vpop.permute.xlu0 %607  ;;  %v599_v14 = vadd.f32 %v591_v48, %v538_v60  ;;  %v600_v12 = vadd.f32 %v592_v19, %v539_v63  ;;  %v1450_v19 = vld [vmem:[%s2436_s3 + $0xf0] sm:$0xff] }
 0x1ca   : > { %v626_v54 = vsel %vm623_vm2, %v620_v2, %v608_v7  ;;  %v638_v56 = vsel %vm623_vm2, %v608_v7, %v620_v2  ;;  %v610_v58 = vpop.permute.xlu1 %609  ;;  %v577_v2 = vsel %vm315_vm0, %v549_v43, %v561_v24  ;;  %v1451_v7 = vld [vmem:[%s2436_s3 + $0xf8] sm:$0xff] }
 0x1cb   : > { %v653_v55 = vmul.f32 %v1440_v46, %v638_v56  ;;  %v654_v9 = vmul.f32 %v1441_v49, %v626_v54  ;;  %v627_v39 = vsel %vm623_vm2, %v2056_v26, %v610_v58  ;;  %v639_v41 = vsel %vm623_vm2, %v610_v58, %v2056_v26 }
 0x1cc   : > { %v593_v46 = vmul.f32 %v1434_v29, %v577_v2  ;;  %v594_v49 = vmul.f32 %v1435_v30, %v565_v3  ;;  %v541_v58 = vadd.f32 %v533_v36, %v472_v50  ;;  %v655_v60 = vmul.f32 %v1442_v37, %v639_v41  ;;  %v1474_v29 = vld [vmem:[%s2436_s3 + $0x1b0] sm:$0xff]  ;;  %v1475_v30 = vld [vmem:[%s2436_s3 + $0x1b8] sm:$0xff] }
 0x1cd   : > { %v670_v15 = vpop.permute.xlu0 %669  ;;  %v661_v24 = vadd.f32 %v653_v55, %v599_v14  ;;  %v662_v31 = vadd.f32 %v654_v9, %v600_v12  ;;  %v656_v63 = vmul.f32 %v1443_v38, %v627_v39  ;;  %v870_v55 = vsel %vm867_vm5, %v2054_v25, %v2048_v17 }
 0x1ce   : > { %v688_v5 = vsel %vm685_vm6, %v2050_v21, %v670_v15  ;;  %v700_v23 = vsel %vm685_vm6, %v670_v15, %v2050_v21  ;;  %v672_v28 = vpop.permute.xlu1 %671  ;;  %v532_v21 = vmul.f32 %v524_v59, %v517_v13  ;;  %v886_v9 = vsel %vm867_vm5, %v2048_v17, %v2054_v25  ;;  %v1473_v17 = vld [vmem:[%s2436_s3 + $0x1a8] sm:$0xff] }
 0x1cf   : > { %v715_v62 = vmul.f32 %v1448_v1, %v700_v23  ;;  %v716_v8 = vmul.f32 %v1449_v6, %v688_v5  ;;  %v689_v26 = vsel %vm685_vm6, %v2060_v27, %v672_v28  ;;  %v701_v54 = vsel %vm685_vm6, %v672_v28, %v2060_v27  ;;  %v1459_v27 = vld [vmem:[%s2436_s3 + $0x138] sm:$0xff] }
 0x1d0   : > { %v540_v56 = vadd.f32 %v532_v21, %v471_v40  ;;  %v602_v57 = vadd.f32 %v594_v49, %v541_v58  ;;  %v717_v53 = vmul.f32 %v1450_v19, %v701_v54  ;;  %v718_v1 = vmul.f32 %v1451_v7, %v689_v26 }
 0x1d1   : > { %v723_v42 = vadd.f32 %v715_v62, %v661_v24  ;;  %v724_v44 = vadd.f32 %v716_v8, %v662_v31  ;;  %v740_v43 = vpop.permute.xlu0 %739  ;;  %v901_v2 = vmul.f32 %v1472_v34, %v870_v55  ;;  %v902_v5 = vmul.f32 %v1473_v17, %v886_v9  ;;  %v1480_v24 = vld [vmem:[%s2436_s3 + $0x1e0] sm:$0xff]  ;;  %v1481_v31 = vld [vmem:[%s2436_s3 + $0x1e8] sm:$0xff] }
 0x1d2   : > { %v742_v52 = vpop.permute.xlu1 %741  ;;  %v601_v25 = vadd.f32 %v593_v46, %v540_v56  ;;  %v664_v15 = vadd.f32 %v656_v63, %v602_v57  ;;  %v932_v23 = vsel %vm929_vm7, %v2058_v61, %v2052_v22  ;;  %v948_v28 = vsel %vm929_vm7, %v2052_v22, %v2058_v61  ;;  %v1483_v46 = vld [vmem:[%s2436_s3 + $0x1f8] sm:$0xff]  ;;  %v287_v34 = vld [vmem:[%s2437_s4] sm:$0xff]  ;;  %v288_v17 = vld [vmem:[%s2437_s4 + $0x8] sm:$0xff] }
 0x1d3   : > { %v785_v47 = vadd.f32 %v777_v32, %v723_v42  ;;  %v786_v48 = vadd.f32 %v778_v35, %v724_v44  ;;  %v747_v40 = vsel %vm743_vm3, %v740_v43, %v742_v52  ;;  %v763_v50 = vsel %vm743_vm3, %v742_v52, %v740_v43 }
 0x1d4   : > { %v663_v12 = vadd.f32 %v655_v60, %v601_v25  ;;  %v779_v16 = vmul.f32 %v1458_v20, %v747_v40  ;;  %v780_v3 = vmul.f32 %v1459_v27, %v763_v50  ;;  %v726_v8 = vadd.f32 %v718_v1, %v664_v15 }
 0x1d5   : > { %v802_v33 = vpop.permute.xlu0 %801  ;;  %v847_v4 = vadd.f32 %v839_v51, %v785_v47  ;;  %v848_v59 = vadd.f32 %v840_v45, %v786_v48  ;;  %v963_v44 = vmul.f32 %v1480_v24, %v932_v23  ;;  %v964_v43 = vmul.f32 %v1481_v31, %v948_v28  ;;  %v1482_v45 = vld [vmem:[%s2436_s3 + $0x1f0] sm:$0xff] }
 0x1d6   : > { %v804_v6 = vpop.permute.xlu1 %803  ;;  %v725_v62 = vadd.f32 %v717_v53, %v663_v12  ;;  %v788_v39 = vadd.f32 %v780_v3, %v726_v8 }
 0x1d7   : > { %v809_v13 = vsel %vm805_vm4, %v802_v33, %v804_v6  ;;  %v825_v14 = vsel %vm805_vm4, %v804_v6, %v802_v33  ;;  %v910_v36 = vadd.f32 %v902_v5, %v848_v59  ;;  %v909_v37 = vadd.f32 %v901_v2, %v847_v4 }
 0x1d8   : > { %v841_v22 = vmul.f32 %v1466_v10, %v809_v13  ;;  %v842_v61 = vmul.f32 %v1467_v11, %v825_v14  ;;  %v787_v38 = vadd.f32 %v779_v16, %v725_v62 }
 0x1d9   : > { %v864_v18 = vpop.permute.xlu0 %863  ;;  %v972_v7 = vadd.f32 %v964_v43, %v910_v36  ;;  %v971_v26 = vadd.f32 %v963_v44, %v909_v37 }
 0x1da   : > { %v866_v32 = vpop.permute.xlu1 %865  ;;  %v849_v49 = vadd.f32 %v841_v22, %v787_v38  ;;  %v850_v52 = vadd.f32 %v842_v61, %v788_v39 }
 0x1db   : > { %v871_v35 = vsel %vm867_vm5, %v864_v18, %v866_v32  ;;  %v887_v21 = vsel %vm867_vm5, %v866_v32, %v864_v18  ;;  %v980_v27 = vmax.f32 %v972_v7, 0.0  ;;  %v979_v40 = vmax.f32 %v971_v26, 0.0 }
 0x1dc   : > { %v903_v41 = vmul.f32 %v1474_v29, %v871_v35  ;;  %v904_v42 = vmul.f32 %v1475_v30, %v887_v21 }
 0x1dd   : > { %v926_v51 = vpop.permute.xlu0 %925 }
 0x1de   : > { %v928_v47 = vpop.permute.xlu1 %927  ;;  %v911_v54 = vadd.f32 %v903_v41, %v849_v49  ;;  %v912_v56 = vadd.f32 %v904_v42, %v850_v52  ;;  %v1123_v41 = vld [vmem:[%s2439_s6] sm:$0xff]  ;;  %v1124_v42 = vld [vmem:[%s2439_s6 + $0x8] sm:$0xff] }
 0x1df   : > { %v933_v48 = vsel %vm929_vm7, %v926_v51, %v928_v47  ;;  %v949_v19 = vsel %vm929_vm7, %v928_v47, %v926_v51  ;;  %v1498_v51 = vld [vmem:[%s2439_s6 + $0x80] sm:$0xff] }
 0x1e0   : > { %v965_v58 = vmul.f32 %v1482_v45, %v933_v48  ;;  %v966_v60 = vmul.f32 %v1483_v46, %v949_v19  ;;  %v1499_v46 = vld [vmem:[%s2439_s6 + $0x88] sm:$0xff]  ;;  %v1486_v47 = vld [vmem:[%s2439_s6 + $0x20] sm:$0xff] }
 0x1e1   : > { %v1487_v48 = vld [vmem:[%s2439_s6 + $0x28] sm:$0xff] }
 0x1e2   : > { %v973_v63 = vadd.f32 %v965_v58, %v911_v54  ;;  %v974_v55 = vadd.f32 %v966_v60, %v912_v56  ;;  %v1502_v54 = vld [vmem:[%s2439_s6 + $0xa0] sm:$0xff]  ;;  %v1503_v56 = vld [vmem:[%s2439_s6 + $0xa8] sm:$0xff] }
 0x1e4   : > { %v981_v9 = vmax.f32 %v973_v63, 0.0  ;;  %v982_v20 = vmax.f32 %v974_v55, 0.0 }
 0x1e6   : > { %v1526_v50 = vpack.c.bf16 %v982_v20, %v980_v27  ;;  %v1528_v33 = vpack.c.bf16 %v981_v9, %v979_v40 }
 0x1e8   : > { %1527 = vmatprep.subr.bf16.mxu1 %v1526_v50  ;;  %v1490_v50 = vld [vmem:[%s2439_s6 + $0x40] sm:$0xff] }
 0x1e9   : > { %1529 = vmatpush1.bf16.msra.mxu1 %v1528_v33  ;;  %v1491_v33 = vld [vmem:[%s2439_s6 + $0x48] sm:$0xff] }
 0x1ec   : > { %1484 = vmatmul.mubr.msk.f32.vlgmr.msra.gmra.mrb[0].mxu1 %vm993_vm8, %v287_v34 }
 0x1ed   : > { %1070 = vmatprep.mubr.f32.mxu1 %v1575_v0 }
 0x1ee   : > { %v986_v25 = vpop.permute.xlu0 %985 }
 0x1ef   : > { %v991_v0 = vpop.permute.xlu1 %990 }
 0x1f0   : > { %1485 = vmatmul.mubr.msk.f32.gmra.mrb[2].mxu1 %vm993_vm8, %v288_v17 }
 0x1f3   : > { %v1083_v12 = vpop.permute.xlu0 %1082 }
 0x1f4   : > { %v1079_v13 = vpop.permute.xlu1 %1078 }
 0x1f9   : > { %v1091_v14 = vpop.permute.xlu1 %1090 }
 0x1fd   : > { %v1095_v15 = vpop.permute.xlu1 %1094 }
 0x2bf   : > { %v1066_v57 = vpop.f32.mrb[0].mxu1 }
 0x2c0   : > { %v1067_v53 = vadd.f32 %v1066_v57, %v986_v25  ;;  %v1068_v1 = vpop.f32.mrb[1].mxu1 }
 0x2c1   : > { %v1069_v6 = vadd.f32 %v1068_v1, %v986_v25 }
 0x2c2   : > { %1111 = vrot.lane.b32.xlu0 %v1067_v53, %s1579_s23  ;;  %v1085_v36 = vmul.f32 %v1079_v13, %v1067_v53 }
 0x2c3   : > { %1230 = vrot.lane.b32.xlu1 %v1069_v6, %s1580_s26  ;;  %v1072_v4 = vpop.f32.mrb[2].mxu1  ;;  %v1086_v37 = vmul.f32 %v1079_v13, %v1069_v6 }
 0x2c4   : > { %v1074_v59 = vpop.f32.mrb[3].mxu1  ;;  %v1073_v10 = vadd.f32 %v1072_v4, %v991_v0  ;;  %v1097_v9 = vadd.f32 %v1091_v14, %v1085_v36 }
 0x2c5   : > { %v1075_v11 = vadd.f32 %v1074_v59, %v991_v0  ;;  %v1098_v20 = vadd.f32 %v1091_v14, %v1086_v37  ;;  %v1510_v37 = vld [vmem:[%s2439_s6 + $0xe0] sm:$0xff] }
 0x2c6   : > { %1141 = vrot.lane.b32.xlu0 %v1067_v53, %s1581_s27  ;;  %v1087_v38 = vmul.f32 %v1083_v12, %v1073_v10 }
 0x2c7   : > { %1261 = vrot.lane.b32.xlu1 %v1069_v6, %s1582_s28  ;;  %v1088_v39 = vmul.f32 %v1083_v12, %v1075_v11  ;;  %v1506_v12 = vld [vmem:[%s2439_s6 + $0xc0] sm:$0xff] }
 0x2c8   : > { %v2297_v27 = vadd.f32 %v1095_v15, %v1087_v38 }
 0x2c9   : > { %v2299_v40 = vadd.f32 %v1095_v15, %v1088_v39 }
 0x2ca   : > { %1172 = vrot.lane.b32.xlu0 %v1067_v53, %s1583_s29 }
 0x2cb   : > { %1292 = vrot.lane.b32.xlu1 %v1069_v6, %s1584_s8 }
 0x2ce   : > { %1203 = vrot.lane.b32.xlu0 %v1067_v53, %s1585_s9 }
 0x2cf   : > { %1323 = vrot.lane.b32.xlu1 %v1069_v6, %s1586_s10 }
 0x2d2   : > { %1228 = vrot.lane.b32.xlu0 %v1067_v53, %s1580_s26 }
 0x2d3   : > { %1113 = vrot.lane.b32.xlu1 %v1073_v10, %s1579_s23 }
 0x2d6   : > { %1259 = vrot.lane.b32.xlu0 %v1067_v53, %s1582_s28 }
 0x2d7   : > { %1143 = vrot.lane.b32.xlu1 %v1073_v10, %s1581_s27 }
 0x2da   : > { %1290 = vrot.lane.b32.xlu0 %v1067_v53, %s1584_s8 }
 0x2db   : > { %1174 = vrot.lane.b32.xlu1 %v1073_v10, %s1583_s29 }
 0x2de   : > { %1321 = vrot.lane.b32.xlu0 %v1067_v53, %s1586_s10 }
 0x2df   : > { %1205 = vrot.lane.b32.xlu1 %v1073_v10, %s1585_s9 }
 0x2e2   : > { %1103 = vrot.lane.b32.xlu0 %v1069_v6, %s1579_s23 }
 0x2e3   : > { %1105 = vrot.lane.b32.xlu1 %v1075_v11, %s1579_s23 }
 0x2e6   : > { %1135 = vrot.lane.b32.xlu0 %v1069_v6, %s1581_s27 }
 0x2e7   : > { %1137 = vrot.lane.b32.xlu1 %v1075_v11, %s1581_s27 }
 0x2ea   : > { %1166 = vrot.lane.b32.xlu0 %v1069_v6, %s1583_s29 }
 0x2eb   : > { %1168 = vrot.lane.b32.xlu1 %v1075_v11, %s1583_s29 }
 0x2ee   : > { %1197 = vrot.lane.b32.xlu0 %v1069_v6, %s1585_s9 }
 0x2ef   : > { %1199 = vrot.lane.b32.xlu1 %v1075_v11, %s1585_s9 }
 0x2f2   : > { %1232 = vrot.lane.b32.xlu0 %v1073_v10, %s1580_s26 }
 0x2f3   : > { %1234 = vrot.lane.b32.xlu1 %v1075_v11, %s1580_s26 }
 0x2f6   : > { %1263 = vrot.lane.b32.xlu0 %v1073_v10, %s1582_s28 }
 0x2f7   : > { %1265 = vrot.lane.b32.xlu1 %v1075_v11, %s1582_s28 }
 0x2fa   : > { %1294 = vrot.lane.b32.xlu0 %v1073_v10, %s1584_s8 }
 0x2fb   : > { %1296 = vrot.lane.b32.xlu1 %v1075_v11, %s1584_s8  ;;  %s2410_s8 = scalar_lea.vmem %s2440_s7, %s1516_s30 }
 0x2fe   : > { %1325 = vrot.lane.b32.xlu0 %v1073_v10, %s1586_s10 }
 0x2ff   : > { %1327 = vrot.lane.b32.xlu1 %v1075_v11, %s1586_s10 }
 0x334   : > { %v1112_v16 = vpop.permute.xlu0 %1111 }
 0x335   : > { %v1231_v3 = vpop.permute.xlu1 %1230 }
 0x338   : > { %v1142_v2 = vpop.permute.xlu0 %1141 }
 0x339   : > { %v1262_v5 = vpop.permute.xlu1 %1261 }
 0x33c   : > { %v1173_v23 = vpop.permute.xlu0 %1172 }
 0x33d   : > { %v1293_v28 = vpop.permute.xlu1 %1292 }
 0x340   : > { %v2255_v18 = vpop.permute.xlu0 %1203 }
 0x341   : > { %v1324_v29 = vpop.permute.xlu1 %1323 }
 0x344   : > { %v1229_v30 = vpop.permute.xlu0 %1228 }
 0x345   : > { %v2257_v24 = vpop.permute.xlu1 %1113  ;;  %v1236_v49 = vsel %vm743_vm3, %v1229_v30, %v1231_v3  ;;  %v1244_v52 = vsel %vm743_vm3, %v1231_v3, %v1229_v30  ;;  %v1507_v30 = vld [vmem:[%s2439_s6 + $0xc8] sm:$0xff] }
 0x346   : > { %v1251_v34 = vmul.f32 %v1498_v51, %v1236_v49  ;;  %v1252_v17 = vmul.f32 %v1499_v46, %v1244_v52 }
 0x348   : > { %v1260_v31 = vpop.permute.xlu0 %1259 }
 0x349   : > { %v2259_v62 = vpop.permute.xlu1 %1143  ;;  %v1267_v58 = vsel %vm805_vm4, %v1260_v31, %v1262_v5  ;;  %v1275_v60 = vsel %vm805_vm4, %v1262_v5, %v1260_v31  ;;  %v1494_v5 = vld [vmem:[%s2439_s6 + $0x60] sm:$0xff] }
 0x34a   : > { %v2307_v1 = vmul.f32 %v1502_v54, %v1267_v58  ;;  %v2309_v6 = vmul.f32 %v1503_v56, %v1275_v60 }
 0x34c   : > { %v1291_v8 = vpop.permute.xlu0 %1290 }
 0x34d   : > { %v2261_v22 = vpop.permute.xlu1 %1174  ;;  %v1298_v15 = vsel %vm867_vm5, %v1291_v8, %v1293_v28 }
 0x34e   : > { %v1313_v49 = vmul.f32 %v1506_v12, %v1298_v15 }
 0x350   : > { %v1322_v61 = vpop.permute.xlu0 %1321 }
 0x351   : > { %v2263_v32 = vpop.permute.xlu1 %1205  ;;  %v1329_v3 = vsel %vm929_vm7, %v1322_v61, %v1324_v29 }
 0x352   : > { %v1344_v60 = vmul.f32 %v1510_v37, %v1329_v3  ;;  %v1508_v37 = vld [vmem:[%s2439_s6 + $0xd0] sm:$0xff] }
 0x354   : > { %v1104_v35 = vpop.permute.xlu0 %1103 }
 0x355   : > { %v1106_v21 = vpop.permute.xlu1 %1105  ;;  %v1115_v44 = vsel %vm501_vm1, %v1112_v16, %v1104_v35  ;;  %v1121_v43 = vsel %vm501_vm1, %v1104_v35, %v1112_v16  ;;  %v1306_v16 = vsel %vm867_vm5, %v1293_v28, %v1291_v8  ;;  %v1125_v28 = vld [vmem:[%s2439_s6 + $0x10] sm:$0xff] }
 0x356   : > { %v1127_v63 = vmul.f32 %v1123_v41, %v1121_v43  ;;  %v1128_v55 = vmul.f32 %v1124_v42, %v1115_v44  ;;  %v1116_v31 = vsel %vm501_vm1, %v2257_v24, %v1106_v21  ;;  %v1122_v8 = vsel %vm501_vm1, %v1106_v21, %v2257_v24  ;;  %v1511_v21 = vld [vmem:[%s2439_s6 + $0xe8] sm:$0xff]  ;;  %v1488_v44 = vld [vmem:[%s2439_s6 + $0x30] sm:$0xff]  ;;  %v1489_v43 = vld [vmem:[%s2439_s6 + $0x38] sm:$0xff] }
 0x357   : > { %v1314_v52 = vmul.f32 %v1507_v30, %v1306_v16 }
 0x358   : > { %v1136_v45 = vpop.permute.xlu0 %1135  ;;  %v1131_v10 = vadd.f32 %v1127_v63, %v1097_v9  ;;  %v1132_v11 = vadd.f32 %v1128_v55, %v1098_v20 }
 0x359   : > { %v1145_v19 = vsel %vm315_vm0, %v1142_v2, %v1136_v45  ;;  %v1151_v7 = vsel %vm315_vm0, %v1136_v45, %v1142_v2  ;;  %v1138_v26 = vpop.permute.xlu1 %1137  ;;  %v1337_v2 = vsel %vm929_vm7, %v1324_v29, %v1322_v61  ;;  %v1126_v29 = vld [vmem:[%s2439_s6 + $0x18] sm:$0xff] }
 0x35a   : > { %v1158_v25 = vmul.f32 %v1486_v47, %v1151_v7  ;;  %v1159_v57 = vmul.f32 %v1487_v48, %v1145_v19  ;;  %v1146_v38 = vsel %vm315_vm0, %v2259_v62, %v1138_v26  ;;  %v1152_v39 = vsel %vm315_vm0, %v1138_v26, %v2259_v62  ;;  %v1492_v48 = vld [vmem:[%s2439_s6 + $0x50] sm:$0xff]  ;;  %v1493_v19 = vld [vmem:[%s2439_s6 + $0x58] sm:$0xff] }
 0x35b   : > { %v1130_v47 = vmul.f32 %v1126_v29, %v1116_v31  ;;  %v1345_v63 = vmul.f32 %v1511_v21, %v1337_v2  ;;  %v1160_v55 = vmul.f32 %v1488_v44, %v1152_v39  ;;  %v1161_v9 = vmul.f32 %v1489_v43, %v1146_v38  ;;  %v1504_v2 = vld [vmem:[%s2439_s6 + $0xb0] sm:$0xff]  ;;  %v1509_v38 = vld [vmem:[%s2439_s6 + $0xd8] sm:$0xff]  ;;  %v1563_v44 = vld [vmem:[%s1655_s12] sm:$0xff] }
 0x35c   : > { %v1167_v53 = vpop.permute.xlu0 %1166  ;;  %v1162_v61 = vadd.f32 %v1158_v25, %v1131_v10  ;;  %v1163_v35 = vadd.f32 %v1159_v57, %v1132_v11  ;;  %v1496_v25 = vld [vmem:[%s2439_s6 + $0x70] sm:$0xff]  ;;  %v1497_v57 = vld [vmem:[%s2439_s6 + $0x78] sm:$0xff] }
 0x35d   : > { %v1176_v4 = vsel %vm623_vm2, %v1173_v23, %v1167_v53  ;;  %v1182_v59 = vsel %vm623_vm2, %v1167_v53, %v1173_v23  ;;  %v1169_v0 = vpop.permute.xlu1 %1168  ;;  %v1495_v23 = vld [vmem:[%s2439_s6 + $0x68] sm:$0xff]  ;;  %v1500_v11 = vld [vmem:[%s2439_s6 + $0x90] sm:$0xff] }
 0x35e   : > { %v1189_v13 = vmul.f32 %v1490_v50, %v1182_v59  ;;  %v1190_v14 = vmul.f32 %v1491_v33, %v1176_v4  ;;  %v1177_v7 = vsel %vm623_vm2, %v2261_v22, %v1169_v0  ;;  %v1183_v26 = vsel %vm623_vm2, %v1169_v0, %v2261_v22 }
 0x35f   : > { %v1134_v59 = vadd.f32 %v1130_v47, %v2299_v40 }
 0x360   : > { %v1198_v36 = vpop.permute.xlu0 %1197  ;;  %v1193_v62 = vadd.f32 %v1189_v13, %v1162_v61  ;;  %v1194_v51 = vadd.f32 %v1190_v14, %v1163_v35  ;;  %v1501_v13 = vld [vmem:[%s2439_s6 + $0x98] sm:$0xff] }
 0x361   : > { %v1207_v41 = vsel %vm685_vm6, %v2255_v18, %v1198_v36  ;;  %v1213_v42 = vsel %vm685_vm6, %v1198_v36, %v2255_v18  ;;  %v1200_v24 = vpop.permute.xlu1 %1199  ;;  %v1129_v18 = vmul.f32 %v1125_v28, %v1122_v8  ;;  %v1165_v12 = vadd.f32 %v1161_v9, %v1134_v59 }
 0x362   : > { %v1220_v45 = vmul.f32 %v1494_v5, %v1213_v42  ;;  %v1221_v46 = vmul.f32 %v1495_v23, %v1207_v41  ;;  %v1208_v22 = vsel %vm685_vm6, %v2263_v32, %v1200_v24  ;;  %v1214_v53 = vsel %vm685_vm6, %v1200_v24, %v2263_v32  ;;  %v1505_v5 = vld [vmem:[%s2439_s6 + $0xb8] sm:$0xff] }
 0x363   : > { %v1133_v4 = vadd.f32 %v1129_v18, %v2297_v27  ;;  %v1222_v15 = vmul.f32 %v1496_v25, %v1214_v53  ;;  %v1223_v16 = vmul.f32 %v1497_v57, %v1208_v22  ;;  %v1565_v25 = vld [vmem:[%s1655_s12 + $0x10] sm:$0xff]  ;;  %v1566_v22 = vld [vmem:[%s1655_s12 + $0x18] sm:$0xff] }
 0x364   : > { %v1224_v54 = vadd.f32 %v1220_v45, %v1193_v62  ;;  %v1225_v56 = vadd.f32 %v1221_v46, %v1194_v51  ;;  %v1233_v58 = vpop.permute.xlu0 %1232  ;;  %v1564_v62 = vld [vmem:[%s1655_s12 + $0x8] sm:$0xff] }
 0x365   : > { %v1235_v20 = vpop.permute.xlu1 %1234  ;;  %v1164_v40 = vadd.f32 %v1160_v55, %v1133_v4 }
 0x366   : > { %v1255_v50 = vadd.f32 %v1251_v34, %v1224_v54  ;;  %v1256_v33 = vadd.f32 %v1252_v17, %v1225_v56  ;;  %v1191_v34 = vmul.f32 %v1492_v48, %v1183_v26  ;;  %v1192_v17 = vmul.f32 %v1493_v19, %v1177_v7  ;;  %v1512_v19 = vld [vmem:[%s2439_s6 + $0xf0] sm:$0xff]  ;;  %v1513_v7 = vld [vmem:[%s2439_s6 + $0xf8] sm:$0xff] }
 0x367   : > { %v1237_v32 = vsel %vm743_vm3, %v1233_v58, %v1235_v20  ;;  %v1245_v27 = vsel %vm743_vm3, %v1235_v20, %v1233_v58 }
 0x368   : > { %v1286_v0 = vadd.f32 %v2307_v1, %v1255_v50  ;;  %v1287_v10 = vadd.f32 %v2309_v6, %v1256_v33  ;;  %v1264_v14 = vpop.permute.xlu0 %1263  ;;  %v1195_v28 = vadd.f32 %v1191_v34, %v1164_v40  ;;  %v1196_v29 = vadd.f32 %v1192_v17, %v1165_v12 }
 0x369   : > { %v1266_v1 = vpop.permute.xlu1 %1265  ;;  %v1253_v31 = vmul.f32 %v1500_v11, %v1237_v32  ;;  %v1254_v8 = vmul.f32 %v1501_v13, %v1245_v27 }
 0x36a   : > { %v1317_v6 = vadd.f32 %v1313_v49, %v1286_v0  ;;  %v1318_v3 = vadd.f32 %v1314_v52, %v1287_v10  ;;  %v1268_v23 = vsel %vm805_vm4, %v1264_v14, %v1266_v1  ;;  %v1276_v30 = vsel %vm805_vm4, %v1266_v1, %v1264_v14 }
 0x36b   : > { %v1226_v39 = vadd.f32 %v1222_v15, %v1195_v28  ;;  %v1227_v41 = vadd.f32 %v1223_v16, %v1196_v29  ;;  %v1284_v42 = vmul.f32 %v1504_v2, %v1268_v23  ;;  %v1285_v24 = vmul.f32 %v1505_v5, %v1276_v30 }
 0x36c   : > { %v1348_v61 = vadd.f32 %v1344_v60, %v1317_v6  ;;  %v1349_v35 = vadd.f32 %v1345_v63, %v1318_v3  ;;  %v1295_v36 = vpop.permute.xlu0 %1294 }
 0x36d   : > { %v1297_v21 = vpop.permute.xlu1 %1296  ;;  %v1257_v49 = vadd.f32 %v1253_v31, %v1226_v39  ;;  %v1258_v52 = vadd.f32 %v1254_v8, %v1227_v41 }
 0x36e   : > { %v1352_v43 = vadd.f32 %v1563_v44, %v1348_v61  ;;  %v1353_v51 = vadd.f32 %v1564_v62, %v1349_v35  ;;  %v1299_v45 = vsel %vm867_vm5, %v1295_v36, %v1297_v21  ;;  %v1307_v46 = vsel %vm867_vm5, %v1297_v21, %v1295_v36 }
 0x36f   : > { %v1315_v18 = vmul.f32 %v1508_v37, %v1299_v45  ;;  %v1316_v47 = vmul.f32 %v1509_v38, %v1307_v46  ;;  %v1288_v26 = vadd.f32 %v1284_v42, %v1257_v49  ;;  %v1289_v54 = vadd.f32 %v1285_v24, %v1258_v52 }
 0x370   : > { %1356 = vst [vmem:[%s2410_s8] sm:$0xff] %v1352_v43  ;;  %1357 = vst [vmem:[%s2410_s8 + $0x8] sm:$0xff] %v1353_v51  ;;  %v1326_v48 = vpop.permute.xlu0 %1325 }
 0x371   : > { %v1328_v56 = vpop.permute.xlu1 %1327  ;;  %v1319_v63 = vadd.f32 %v1315_v18, %v1288_v26  ;;  %v1320_v55 = vadd.f32 %v1316_v47, %v1289_v54 }
 0x372   : > { %v1330_v58 = vsel %vm929_vm7, %v1326_v48, %v1328_v56  ;;  %v1338_v60 = vsel %vm929_vm7, %v1328_v56, %v1326_v48 }
 0x373   : > { %v1346_v9 = vmul.f32 %v1512_v19, %v1330_v58  ;;  %v1347_v20 = vmul.f32 %v1513_v7, %v1338_v60 }
 0x375   : > { %v1350_v50 = vadd.f32 %v1346_v9, %v1319_v63  ;;  %v1351_v33 = vadd.f32 %v1347_v20, %v1320_v55 }
 0x377   : > { %v1354_v57 = vadd.f32 %v1565_v25, %v1350_v50  ;;  %v1355_v53 = vadd.f32 %v1566_v22, %v1351_v33 }
 0x379   : > { %1358 = vst [vmem:[%s2410_s8 + $0x10] sm:$0xff] %v1354_v57  ;;  %1359 = vst [vmem:[%s2410_s8 + $0x18] sm:$0xff] %v1355_v53 }
 0x37a PF: > { %s17_s24 = sadd.s32 1, %s1573_s24  }
 0x37b   : > { %p14_p4 = scmp.ge.s32.totalorder %s17_s24, 4  }
 0x37d   :  { %16 = sbr.rel (!%p14_p4) target bundleno = 1 (0x1), region = 92 }

</bundles_post_ra>
